<compile_context>
chip_gen: v6e
topology: v6e:2x2x1
jax: 0.10.0
libtpu: 0.0.40
codegen_flags: <defaults>
</compile_context>

<pallas_src>
import functools

import jax
import jax.numpy as jnp
from jax.experimental import pallas as pl
from jax.experimental.pallas import tpu as pltpu

HIDDEN = 32
N_CLASSES = 3
LANES = 128
MAX_TILE_R = 2048   # sublane rows of 128 lanes per grid step
SPLIT_ROWS = 64     # if >= this many rows, force >= 2 grid steps (v7x 2 TCs)


def _round_up(a, b):
    return -(-a // b) * b


def _make_kernel(chunk, n_chunks, compute_dtype):
    """Build the kernel for a fixed (chunk, n_chunks, compute_dtype)."""

    def kernel(w1_ref, b1_ref, w2_ref, b2_ref, x_ref, o_ref):
        cdt = compute_dtype
        # Hoist all SMEM scalar reads (+ casts) out of the chunk loop.
        w1s = [w1_ref[j].astype(cdt) for j in range(HIDDEN)]
        b1s = [b1_ref[j].astype(cdt) for j in range(HIDDEN)]
        w2s = [w2_ref[k].astype(cdt) for k in range(HIDDEN * N_CLASSES)]
        b2s = [b2_ref[c] for c in range(N_CLASSES)]        # f32 (accumulate in f32)

        def body(c, carry):
            r0 = pl.multiple_of(c * chunk, chunk)
            x = x_ref[pl.ds(r0, chunk), :].astype(cdt)      # (chunk, 128), register-resident

            # j = 0: fold the output bias into the accumulator init.
            h = jnp.maximum(x * w1s[0] + b1s[0], 0.0)
            acc0 = (h * w2s[0]).astype(jnp.float32) + b2s[0]
            acc1 = (h * w2s[1]).astype(jnp.float32) + b2s[1]
            acc2 = (h * w2s[2]).astype(jnp.float32) + b2s[2]

            # Fully unrolled hidden loop: pure VPU broadcast FMAs, no MXU.
            for j in range(1, HIDDEN):
                h = jnp.maximum(x * w1s[j] + b1s[j], 0.0)
                acc0 = acc0 + (h * w2s[3 * j + 0]).astype(jnp.float32)
                acc1 = acc1 + (h * w2s[3 * j + 1]).astype(jnp.float32)
                acc2 = acc2 + (h * w2s[3 * j + 2]).astype(jnp.float32)

            # One lane-dense (chunk, 128) store per class plane.
            o_ref[0, pl.ds(r0, chunk), :] = acc0.astype(o_ref.dtype)
            o_ref[1, pl.ds(r0, chunk), :] = acc1.astype(o_ref.dtype)
            o_ref[2, pl.ds(r0, chunk), :] = acc2.astype(o_ref.dtype)
            return carry

        jax.lax.fori_loop(0, n_chunks, body, 0)

    return kernel


def temp_season_net(x, w1, b1, w2, b2, *, compute_dtype=jnp.float32,
                    out_dtype=None, planes=False):
    """Forward pass of TempSeasonNet.

    x:  (B, 1) float32
    w1: (1, 32), b1: (1, 32)   (torch weight stored transposed)
    w2: (32, 3), b2: (1, 3)
    returns (B, 3) logits (or the raw (3, R_pad, 128) planes if planes=True).
    """
    B = x.shape[0]
    out_dtype = compute_dtype if out_dtype is None else out_dtype

    # Flatten params for SMEM scalar access. w2 row-major: w2[j, c] -> 3*j + c.
    w1f = w1.reshape(-1).astype(jnp.float32)   # (32,)
    b1f = b1.reshape(-1).astype(jnp.float32)   # (32,)
    w2f = w2.reshape(-1).astype(jnp.float32)   # (96,)
    b2f = b2.reshape(-1).astype(jnp.float32)   # (3,)

    # Lane-dense layout: batch -> (R_pad, 128) slab.
    R = -(-B // LANES)
    R8 = _round_up(R, 8)                       # (8,128) sublane alignment
    if R8 > MAX_TILE_R:
        tile_r = MAX_TILE_R
    elif R8 >= SPLIT_ROWS:
        # Split into >= 2 grid steps so the "parallel" axis can use both
        # TensorCores on v7x.
        tile_r = min(MAX_TILE_R, _round_up(-(-R8 // 2), 32))
    else:
        tile_r = R8
    R_pad = _round_up(R8, tile_r)
    B_pad = R_pad * LANES

    # In-kernel register-resident chunk: largest of (32,16,8) dividing tile_r.
    chunk = next(c for c in (32, 16, 8) if tile_r % c == 0)
    n_chunks = tile_r // chunk

    xf = x.reshape(-1).astype(jnp.float32)
    if B_pad != B:                              # skip the pad copy when aligned
        xf = jnp.pad(xf, (0, B_pad - B))
    x2 = xf.reshape(R_pad, LANES)

    grid = (R_pad // tile_r,)

    out_planes = pl.pallas_call(
        _make_kernel(chunk, n_chunks, compute_dtype),
        out_shape=jax.ShapeDtypeStruct((N_CLASSES, R_pad, LANES), out_dtype),
        grid=grid,
        in_specs=[
            pl.BlockSpec(memory_space=pltpu.MemorySpace.SMEM),   # w1 (32,)
            pl.BlockSpec(memory_space=pltpu.MemorySpace.SMEM),   # b1 (32,)
            pl.BlockSpec(memory_space=pltpu.MemorySpace.SMEM),   # w2 (96,)
            pl.BlockSpec(memory_space=pltpu.MemorySpace.SMEM),   # b2 (3,)
            pl.BlockSpec((tile_r, LANES), lambda i: (i, 0)),     # x tile
        ],
        out_specs=pl.BlockSpec((N_CLASSES, tile_r, LANES), lambda i: (0, i, 0)),
        compiler_params=pltpu.CompilerParams(
            dimension_semantics=("parallel",),
        ),
    )(w1f, b1f, w2f, b2f, x2)

    if planes:
        # Lane-dense layout for layout-aware consumers (no transpose tax);
        # logical element b lives at plane[:, b // 128, b % 128].
        return out_planes

    # (3, R_pad, 128) -> (B, 3) to match the module's output semantics.
    return out_planes.transpose(1, 2, 0).reshape(B_pad, N_CLASSES)[:B]


def init_params(key):
    """Deterministic parameter init matching nn.Linear shapes (stored transposed)."""
    k1, k2, k3, k4 = jax.random.split(key, 4)
    # nn.Linear(1, 32): weight (32,1) -> stored (1,32); bias (32,) -> (1,32)
    bound1 = 1.0  # 1/sqrt(in_features=1)
    w1 = jax.random.uniform(k1, (1, HIDDEN), jnp.float32, -bound1, bound1)
    b1 = jax.random.uniform(k2, (1, HIDDEN), jnp.float32, -bound1, bound1)
    # nn.Linear(32, 3): weight (3,32) -> stored (32,3); bias (3,) -> (1,3)
    bound2 = 1.0 / (HIDDEN ** 0.5)
    w2 = jax.random.uniform(k3, (HIDDEN, N_CLASSES), jnp.float32, -bound2, bound2)
    b2 = jax.random.uniform(k4, (1, N_CLASSES), jnp.float32, -bound2, bound2)
    return w1, b1, w2, b2


def _reference(x, w1, b1, w2, b2):
    return jnp.maximum(x @ w1 + b1, 0.0) @ w2 + b2


if __name__ == "__main__":
    key = jax.random.PRNGKey(0)
    kx, kx2, kx3, kp = jax.random.split(key, 4)
    w1, b1, w2, b2 = init_params(kp)

    # Small batch (matches the original module's use: temperature -> season logits).
    B = 8
    x = jax.random.uniform(kx, (B, 1), jnp.float32, -10.0, 40.0)
    out = jax.block_until_ready(temp_season_net(x, w1, b1, w2, b2))
    ref = _reference(x, w1, b1, w2, b2)
    assert out.shape == (B, N_CLASSES)
    assert jnp.allclose(out, ref, atol=1e-4, rtol=1e-4)

    # Non-multiple-of-128 batch exercises the lane padding / un-padding path.
    B2 = 300
    x2 = jax.random.uniform(kx2, (B2, 1), jnp.float32, -10.0, 40.0)
    out2 = jax.block_until_ready(temp_season_net(x2, w1, b1, w2, b2))
    ref2 = _reference(x2, w1, b1, w2, b2)
    assert out2.shape == (B2, N_CLASSES)
    assert jnp.allclose(out2, ref2, atol=1e-4, rtol=1e-4)

    # Larger batch exercises the multi-grid-step ("parallel") path and the
    # 32-row register-resident chunk loop.
    B3 = 8192
    x3 = jax.random.uniform(kx3, (B3, 1), jnp.float32, -10.0, 40.0)
    out3 = jax.block_until_ready(temp_season_net(x3, w1, b1, w2, b2))
    ref3 = _reference(x3, w1, b1, w2, b2)
    assert out3.shape == (B3, N_CLASSES)
    assert jnp.allclose(out3, ref3, atol=1e-4, rtol=1e-4)

    # bf16 compute path (v6e/v7x VALU doubling); accumulation stays f32.
    out_bf = jax.block_until_ready(
        temp_season_net(x2, w1, b1, w2, b2, compute_dtype=jnp.bfloat16))
    assert out_bf.shape == (B2, N_CLASSES)
    assert jnp.allclose(out_bf.astype(jnp.float32), ref2, atol=1.0, rtol=5e-2)

    print("KERNEL_OK")
</pallas_src>

<mosaic_0001>
module attributes {stable_mosaic.version = 11 : i64} {
  func.func @kernel(%arg0: i32, %arg1: memref<32xf32, #tpu.memory_space<smem>>, %arg2: memref<32xf32, #tpu.memory_space<smem>>, %arg3: memref<96xf32, #tpu.memory_space<smem>>, %arg4: memref<3xf32, #tpu.memory_space<smem>>, %arg5: memref<8x128xf32, #tpu.memory_space<vmem>>, %arg6: memref<3x8x128xf32, #tpu.memory_space<vmem>>) attributes {dimension_semantics = [#tpu.dimension_semantics<parallel>], iteration_bounds = array<i64: 1>, scalar_prefetch = 0 : i64, scratch_operands = 0 : i64, tpu.core_type = #tpu.core_type<tc>, window_params = [{transform_indices = @transform_0, window_bounds = array<i64: 32>}, {transform_indices = @transform_1, window_bounds = array<i64: 32>}, {transform_indices = @transform_2, window_bounds = array<i64: 96>}, {transform_indices = @transform_3, window_bounds = array<i64: 3>}, {transform_indices = @transform_4, window_bounds = array<i64: 8, 128>}, {transform_indices = @transform_5, window_bounds = array<i64: 3, 8, 128>}]} {
    %c0 = arith.constant 0 : index
    %0 = memref.load %arg1[%c0] : memref<32xf32, #tpu.memory_space<smem>>
    %c1 = arith.constant 1 : index
    %1 = memref.load %arg1[%c1] : memref<32xf32, #tpu.memory_space<smem>>
    %c2 = arith.constant 2 : index
    %2 = memref.load %arg1[%c2] : memref<32xf32, #tpu.memory_space<smem>>
    %c3 = arith.constant 3 : index
    %3 = memref.load %arg1[%c3] : memref<32xf32, #tpu.memory_space<smem>>
    %c4 = arith.constant 4 : index
    %4 = memref.load %arg1[%c4] : memref<32xf32, #tpu.memory_space<smem>>
    %c5 = arith.constant 5 : index
    %5 = memref.load %arg1[%c5] : memref<32xf32, #tpu.memory_space<smem>>
    %c6 = arith.constant 6 : index
    %6 = memref.load %arg1[%c6] : memref<32xf32, #tpu.memory_space<smem>>
    %c7 = arith.constant 7 : index
    %7 = memref.load %arg1[%c7] : memref<32xf32, #tpu.memory_space<smem>>
    %c8 = arith.constant 8 : index
    %8 = memref.load %arg1[%c8] : memref<32xf32, #tpu.memory_space<smem>>
    %c9 = arith.constant 9 : index
    %9 = memref.load %arg1[%c9] : memref<32xf32, #tpu.memory_space<smem>>
    %c10 = arith.constant 10 : index
    %10 = memref.load %arg1[%c10] : memref<32xf32, #tpu.memory_space<smem>>
    %c11 = arith.constant 11 : index
    %11 = memref.load %arg1[%c11] : memref<32xf32, #tpu.memory_space<smem>>
    %c12 = arith.constant 12 : index
    %12 = memref.load %arg1[%c12] : memref<32xf32, #tpu.memory_space<smem>>
    %c13 = arith.constant 13 : index
    %13 = memref.load %arg1[%c13] : memref<32xf32, #tpu.memory_space<smem>>
    %c14 = arith.constant 14 : index
    %14 = memref.load %arg1[%c14] : memref<32xf32, #tpu.memory_space<smem>>
    %c15 = arith.constant 15 : index
    %15 = memref.load %arg1[%c15] : memref<32xf32, #tpu.memory_space<smem>>
    %c16 = arith.constant 16 : index
    %16 = memref.load %arg1[%c16] : memref<32xf32, #tpu.memory_space<smem>>
    %c17 = arith.constant 17 : index
    %17 = memref.load %arg1[%c17] : memref<32xf32, #tpu.memory_space<smem>>
    %c18 = arith.constant 18 : index
    %18 = memref.load %arg1[%c18] : memref<32xf32, #tpu.memory_space<smem>>
    %c19 = arith.constant 19 : index
    %19 = memref.load %arg1[%c19] : memref<32xf32, #tpu.memory_space<smem>>
    %c20 = arith.constant 20 : index
    %20 = memref.load %arg1[%c20] : memref<32xf32, #tpu.memory_space<smem>>
    %c21 = arith.constant 21 : index
    %21 = memref.load %arg1[%c21] : memref<32xf32, #tpu.memory_space<smem>>
    %c22 = arith.constant 22 : index
    %22 = memref.load %arg1[%c22] : memref<32xf32, #tpu.memory_space<smem>>
    %c23 = arith.constant 23 : index
    %23 = memref.load %arg1[%c23] : memref<32xf32, #tpu.memory_space<smem>>
    %c24 = arith.constant 24 : index
    %24 = memref.load %arg1[%c24] : memref<32xf32, #tpu.memory_space<smem>>
    %c25 = arith.constant 25 : index
    %25 = memref.load %arg1[%c25] : memref<32xf32, #tpu.memory_space<smem>>
    %c26 = arith.constant 26 : index
    %26 = memref.load %arg1[%c26] : memref<32xf32, #tpu.memory_space<smem>>
    %c27 = arith.constant 27 : index
    %27 = memref.load %arg1[%c27] : memref<32xf32, #tpu.memory_space<smem>>
    %c28 = arith.constant 28 : index
    %28 = memref.load %arg1[%c28] : memref<32xf32, #tpu.memory_space<smem>>
    %c29 = arith.constant 29 : index
    %29 = memref.load %arg1[%c29] : memref<32xf32, #tpu.memory_space<smem>>
    %c30 = arith.constant 30 : index
    %30 = memref.load %arg1[%c30] : memref<32xf32, #tpu.memory_space<smem>>
    %c31 = arith.constant 31 : index
    %31 = memref.load %arg1[%c31] : memref<32xf32, #tpu.memory_space<smem>>
    %c0_0 = arith.constant 0 : index
    %32 = memref.load %arg2[%c0_0] : memref<32xf32, #tpu.memory_space<smem>>
    %c1_1 = arith.constant 1 : index
    %33 = memref.load %arg2[%c1_1] : memref<32xf32, #tpu.memory_space<smem>>
    %c2_2 = arith.constant 2 : index
    %34 = memref.load %arg2[%c2_2] : memref<32xf32, #tpu.memory_space<smem>>
    %c3_3 = arith.constant 3 : index
    %35 = memref.load %arg2[%c3_3] : memref<32xf32, #tpu.memory_space<smem>>
    %c4_4 = arith.constant 4 : index
    %36 = memref.load %arg2[%c4_4] : memref<32xf32, #tpu.memory_space<smem>>
    %c5_5 = arith.constant 5 : index
    %37 = memref.load %arg2[%c5_5] : memref<32xf32, #tpu.memory_space<smem>>
    %c6_6 = arith.constant 6 : index
    %38 = memref.load %arg2[%c6_6] : memref<32xf32, #tpu.memory_space<smem>>
    %c7_7 = arith.constant 7 : index
    %39 = memref.load %arg2[%c7_7] : memref<32xf32, #tpu.memory_space<smem>>
    %c8_8 = arith.constant 8 : index
    %40 = memref.load %arg2[%c8_8] : memref<32xf32, #tpu.memory_space<smem>>
    %c9_9 = arith.constant 9 : index
    %41 = memref.load %arg2[%c9_9] : memref<32xf32, #tpu.memory_space<smem>>
    %c10_10 = arith.constant 10 : index
    %42 = memref.load %arg2[%c10_10] : memref<32xf32, #tpu.memory_space<smem>>
    %c11_11 = arith.constant 11 : index
    %43 = memref.load %arg2[%c11_11] : memref<32xf32, #tpu.memory_space<smem>>
    %c12_12 = arith.constant 12 : index
    %44 = memref.load %arg2[%c12_12] : memref<32xf32, #tpu.memory_space<smem>>
    %c13_13 = arith.constant 13 : index
    %45 = memref.load %arg2[%c13_13] : memref<32xf32, #tpu.memory_space<smem>>
    %c14_14 = arith.constant 14 : index
    %46 = memref.load %arg2[%c14_14] : memref<32xf32, #tpu.memory_space<smem>>
    %c15_15 = arith.constant 15 : index
    %47 = memref.load %arg2[%c15_15] : memref<32xf32, #tpu.memory_space<smem>>
    %c16_16 = arith.constant 16 : index
    %48 = memref.load %arg2[%c16_16] : memref<32xf32, #tpu.memory_space<smem>>
    %c17_17 = arith.constant 17 : index
    %49 = memref.load %arg2[%c17_17] : memref<32xf32, #tpu.memory_space<smem>>
    %c18_18 = arith.constant 18 : index
    %50 = memref.load %arg2[%c18_18] : memref<32xf32, #tpu.memory_space<smem>>
    %c19_19 = arith.constant 19 : index
    %51 = memref.load %arg2[%c19_19] : memref<32xf32, #tpu.memory_space<smem>>
    %c20_20 = arith.constant 20 : index
    %52 = memref.load %arg2[%c20_20] : memref<32xf32, #tpu.memory_space<smem>>
    %c21_21 = arith.constant 21 : index
    %53 = memref.load %arg2[%c21_21] : memref<32xf32, #tpu.memory_space<smem>>
    %c22_22 = arith.constant 22 : index
    %54 = memref.load %arg2[%c22_22] : memref<32xf32, #tpu.memory_space<smem>>
    %c23_23 = arith.constant 23 : index
    %55 = memref.load %arg2[%c23_23] : memref<32xf32, #tpu.memory_space<smem>>
    %c24_24 = arith.constant 24 : index
    %56 = memref.load %arg2[%c24_24] : memref<32xf32, #tpu.memory_space<smem>>
    %c25_25 = arith.constant 25 : index
    %57 = memref.load %arg2[%c25_25] : memref<32xf32, #tpu.memory_space<smem>>
    %c26_26 = arith.constant 26 : index
    %58 = memref.load %arg2[%c26_26] : memref<32xf32, #tpu.memory_space<smem>>
    %c27_27 = arith.constant 27 : index
    %59 = memref.load %arg2[%c27_27] : memref<32xf32, #tpu.memory_space<smem>>
    %c28_28 = arith.constant 28 : index
    %60 = memref.load %arg2[%c28_28] : memref<32xf32, #tpu.memory_space<smem>>
    %c29_29 = arith.constant 29 : index
    %61 = memref.load %arg2[%c29_29] : memref<32xf32, #tpu.memory_space<smem>>
    %c30_30 = arith.constant 30 : index
    %62 = memref.load %arg2[%c30_30] : memref<32xf32, #tpu.memory_space<smem>>
    %c31_31 = arith.constant 31 : index
    %63 = memref.load %arg2[%c31_31] : memref<32xf32, #tpu.memory_space<smem>>
    %c0_32 = arith.constant 0 : index
    %64 = memref.load %arg3[%c0_32] : memref<96xf32, #tpu.memory_space<smem>>
    %c1_33 = arith.constant 1 : index
    %65 = memref.load %arg3[%c1_33] : memref<96xf32, #tpu.memory_space<smem>>
    %c2_34 = arith.constant 2 : index
    %66 = memref.load %arg3[%c2_34] : memref<96xf32, #tpu.memory_space<smem>>
    %c3_35 = arith.constant 3 : index
    %67 = memref.load %arg3[%c3_35] : memref<96xf32, #tpu.memory_space<smem>>
    %c4_36 = arith.constant 4 : index
    %68 = memref.load %arg3[%c4_36] : memref<96xf32, #tpu.memory_space<smem>>
    %c5_37 = arith.constant 5 : index
    %69 = memref.load %arg3[%c5_37] : memref<96xf32, #tpu.memory_space<smem>>
    %c6_38 = arith.constant 6 : index
    %70 = memref.load %arg3[%c6_38] : memref<96xf32, #tpu.memory_space<smem>>
    %c7_39 = arith.constant 7 : index
    %71 = memref.load %arg3[%c7_39] : memref<96xf32, #tpu.memory_space<smem>>
    %c8_40 = arith.constant 8 : index
    %72 = memref.load %arg3[%c8_40] : memref<96xf32, #tpu.memory_space<smem>>
    %c9_41 = arith.constant 9 : index
    %73 = memref.load %arg3[%c9_41] : memref<96xf32, #tpu.memory_space<smem>>
    %c10_42 = arith.constant 10 : index
    %74 = memref.load %arg3[%c10_42] : memref<96xf32, #tpu.memory_space<smem>>
    %c11_43 = arith.constant 11 : index
    %75 = memref.load %arg3[%c11_43] : memref<96xf32, #tpu.memory_space<smem>>
    %c12_44 = arith.constant 12 : index
    %76 = memref.load %arg3[%c12_44] : memref<96xf32, #tpu.memory_space<smem>>
    %c13_45 = arith.constant 13 : index
    %77 = memref.load %arg3[%c13_45] : memref<96xf32, #tpu.memory_space<smem>>
    %c14_46 = arith.constant 14 : index
    %78 = memref.load %arg3[%c14_46] : memref<96xf32, #tpu.memory_space<smem>>
    %c15_47 = arith.constant 15 : index
    %79 = memref.load %arg3[%c15_47] : memref<96xf32, #tpu.memory_space<smem>>
    %c16_48 = arith.constant 16 : index
    %80 = memref.load %arg3[%c16_48] : memref<96xf32, #tpu.memory_space<smem>>
    %c17_49 = arith.constant 17 : index
    %81 = memref.load %arg3[%c17_49] : memref<96xf32, #tpu.memory_space<smem>>
    %c18_50 = arith.constant 18 : index
    %82 = memref.load %arg3[%c18_50] : memref<96xf32, #tpu.memory_space<smem>>
    %c19_51 = arith.constant 19 : index
    %83 = memref.load %arg3[%c19_51] : memref<96xf32, #tpu.memory_space<smem>>
    %c20_52 = arith.constant 20 : index
    %84 = memref.load %arg3[%c20_52] : memref<96xf32, #tpu.memory_space<smem>>
    %c21_53 = arith.constant 21 : index
    %85 = memref.load %arg3[%c21_53] : memref<96xf32, #tpu.memory_space<smem>>
    %c22_54 = arith.constant 22 : index
    %86 = memref.load %arg3[%c22_54] : memref<96xf32, #tpu.memory_space<smem>>
    %c23_55 = arith.constant 23 : index
    %87 = memref.load %arg3[%c23_55] : memref<96xf32, #tpu.memory_space<smem>>
    %c24_56 = arith.constant 24 : index
    %88 = memref.load %arg3[%c24_56] : memref<96xf32, #tpu.memory_space<smem>>
    %c25_57 = arith.constant 25 : index
    %89 = memref.load %arg3[%c25_57] : memref<96xf32, #tpu.memory_space<smem>>
    %c26_58 = arith.constant 26 : index
    %90 = memref.load %arg3[%c26_58] : memref<96xf32, #tpu.memory_space<smem>>
    %c27_59 = arith.constant 27 : index
    %91 = memref.load %arg3[%c27_59] : memref<96xf32, #tpu.memory_space<smem>>
    %c28_60 = arith.constant 28 : index
    %92 = memref.load %arg3[%c28_60] : memref<96xf32, #tpu.memory_space<smem>>
    %c29_61 = arith.constant 29 : index
    %93 = memref.load %arg3[%c29_61] : memref<96xf32, #tpu.memory_space<smem>>
    %c30_62 = arith.constant 30 : index
    %94 = memref.load %arg3[%c30_62] : memref<96xf32, #tpu.memory_space<smem>>
    %c31_63 = arith.constant 31 : index
    %95 = memref.load %arg3[%c31_63] : memref<96xf32, #tpu.memory_space<smem>>
    %c32 = arith.constant 32 : index
    %96 = memref.load %arg3[%c32] : memref<96xf32, #tpu.memory_space<smem>>
    %c33 = arith.constant 33 : index
    %97 = memref.load %arg3[%c33] : memref<96xf32, #tpu.memory_space<smem>>
    %c34 = arith.constant 34 : index
    %98 = memref.load %arg3[%c34] : memref<96xf32, #tpu.memory_space<smem>>
    %c35 = arith.constant 35 : index
    %99 = memref.load %arg3[%c35] : memref<96xf32, #tpu.memory_space<smem>>
    %c36 = arith.constant 36 : index
    %100 = memref.load %arg3[%c36] : memref<96xf32, #tpu.memory_space<smem>>
    %c37 = arith.constant 37 : index
    %101 = memref.load %arg3[%c37] : memref<96xf32, #tpu.memory_space<smem>>
    %c38 = arith.constant 38 : index
    %102 = memref.load %arg3[%c38] : memref<96xf32, #tpu.memory_space<smem>>
    %c39 = arith.constant 39 : index
    %103 = memref.load %arg3[%c39] : memref<96xf32, #tpu.memory_space<smem>>
    %c40 = arith.constant 40 : index
    %104 = memref.load %arg3[%c40] : memref<96xf32, #tpu.memory_space<smem>>
    %c41 = arith.constant 41 : index
    %105 = memref.load %arg3[%c41] : memref<96xf32, #tpu.memory_space<smem>>
    %c42 = arith.constant 42 : index
    %106 = memref.load %arg3[%c42] : memref<96xf32, #tpu.memory_space<smem>>
    %c43 = arith.constant 43 : index
    %107 = memref.load %arg3[%c43] : memref<96xf32, #tpu.memory_space<smem>>
    %c44 = arith.constant 44 : index
    %108 = memref.load %arg3[%c44] : memref<96xf32, #tpu.memory_space<smem>>
    %c45 = arith.constant 45 : index
    %109 = memref.load %arg3[%c45] : memref<96xf32, #tpu.memory_space<smem>>
    %c46 = arith.constant 46 : index
    %110 = memref.load %arg3[%c46] : memref<96xf32, #tpu.memory_space<smem>>
    %c47 = arith.constant 47 : index
    %111 = memref.load %arg3[%c47] : memref<96xf32, #tpu.memory_space<smem>>
    %c48 = arith.constant 48 : index
    %112 = memref.load %arg3[%c48] : memref<96xf32, #tpu.memory_space<smem>>
    %c49 = arith.constant 49 : index
    %113 = memref.load %arg3[%c49] : memref<96xf32, #tpu.memory_space<smem>>
    %c50 = arith.constant 50 : index
    %114 = memref.load %arg3[%c50] : memref<96xf32, #tpu.memory_space<smem>>
    %c51 = arith.constant 51 : index
    %115 = memref.load %arg3[%c51] : memref<96xf32, #tpu.memory_space<smem>>
    %c52 = arith.constant 52 : index
    %116 = memref.load %arg3[%c52] : memref<96xf32, #tpu.memory_space<smem>>
    %c53 = arith.constant 53 : index
    %117 = memref.load %arg3[%c53] : memref<96xf32, #tpu.memory_space<smem>>
    %c54 = arith.constant 54 : index
    %118 = memref.load %arg3[%c54] : memref<96xf32, #tpu.memory_space<smem>>
    %c55 = arith.constant 55 : index
    %119 = memref.load %arg3[%c55] : memref<96xf32, #tpu.memory_space<smem>>
    %c56 = arith.constant 56 : index
    %120 = memref.load %arg3[%c56] : memref<96xf32, #tpu.memory_space<smem>>
    %c57 = arith.constant 57 : index
    %121 = memref.load %arg3[%c57] : memref<96xf32, #tpu.memory_space<smem>>
    %c58 = arith.constant 58 : index
    %122 = memref.load %arg3[%c58] : memref<96xf32, #tpu.memory_space<smem>>
    %c59 = arith.constant 59 : index
    %123 = memref.load %arg3[%c59] : memref<96xf32, #tpu.memory_space<smem>>
    %c60 = arith.constant 60 : index
    %124 = memref.load %arg3[%c60] : memref<96xf32, #tpu.memory_space<smem>>
    %c61 = arith.constant 61 : index
    %125 = memref.load %arg3[%c61] : memref<96xf32, #tpu.memory_space<smem>>
    %c62 = arith.constant 62 : index
    %126 = memref.load %arg3[%c62] : memref<96xf32, #tpu.memory_space<smem>>
    %c63 = arith.constant 63 : index
    %127 = memref.load %arg3[%c63] : memref<96xf32, #tpu.memory_space<smem>>
    %c64 = arith.constant 64 : index
    %128 = memref.load %arg3[%c64] : memref<96xf32, #tpu.memory_space<smem>>
    %c65 = arith.constant 65 : index
    %129 = memref.load %arg3[%c65] : memref<96xf32, #tpu.memory_space<smem>>
    %c66 = arith.constant 66 : index
    %130 = memref.load %arg3[%c66] : memref<96xf32, #tpu.memory_space<smem>>
    %c67 = arith.constant 67 : index
    %131 = memref.load %arg3[%c67] : memref<96xf32, #tpu.memory_space<smem>>
    %c68 = arith.constant 68 : index
    %132 = memref.load %arg3[%c68] : memref<96xf32, #tpu.memory_space<smem>>
    %c69 = arith.constant 69 : index
    %133 = memref.load %arg3[%c69] : memref<96xf32, #tpu.memory_space<smem>>
    %c70 = arith.constant 70 : index
    %134 = memref.load %arg3[%c70] : memref<96xf32, #tpu.memory_space<smem>>
    %c71 = arith.constant 71 : index
    %135 = memref.load %arg3[%c71] : memref<96xf32, #tpu.memory_space<smem>>
    %c72 = arith.constant 72 : index
    %136 = memref.load %arg3[%c72] : memref<96xf32, #tpu.memory_space<smem>>
    %c73 = arith.constant 73 : index
    %137 = memref.load %arg3[%c73] : memref<96xf32, #tpu.memory_space<smem>>
    %c74 = arith.constant 74 : index
    %138 = memref.load %arg3[%c74] : memref<96xf32, #tpu.memory_space<smem>>
    %c75 = arith.constant 75 : index
    %139 = memref.load %arg3[%c75] : memref<96xf32, #tpu.memory_space<smem>>
    %c76 = arith.constant 76 : index
    %140 = memref.load %arg3[%c76] : memref<96xf32, #tpu.memory_space<smem>>
    %c77 = arith.constant 77 : index
    %141 = memref.load %arg3[%c77] : memref<96xf32, #tpu.memory_space<smem>>
    %c78 = arith.constant 78 : index
    %142 = memref.load %arg3[%c78] : memref<96xf32, #tpu.memory_space<smem>>
    %c79 = arith.constant 79 : index
    %143 = memref.load %arg3[%c79] : memref<96xf32, #tpu.memory_space<smem>>
    %c80 = arith.constant 80 : index
    %144 = memref.load %arg3[%c80] : memref<96xf32, #tpu.memory_space<smem>>
    %c81 = arith.constant 81 : index
    %145 = memref.load %arg3[%c81] : memref<96xf32, #tpu.memory_space<smem>>
    %c82 = arith.constant 82 : index
    %146 = memref.load %arg3[%c82] : memref<96xf32, #tpu.memory_space<smem>>
    %c83 = arith.constant 83 : index
    %147 = memref.load %arg3[%c83] : memref<96xf32, #tpu.memory_space<smem>>
    %c84 = arith.constant 84 : index
    %148 = memref.load %arg3[%c84] : memref<96xf32, #tpu.memory_space<smem>>
    %c85 = arith.constant 85 : index
    %149 = memref.load %arg3[%c85] : memref<96xf32, #tpu.memory_space<smem>>
    %c86 = arith.constant 86 : index
    %150 = memref.load %arg3[%c86] : memref<96xf32, #tpu.memory_space<smem>>
    %c87 = arith.constant 87 : index
    %151 = memref.load %arg3[%c87] : memref<96xf32, #tpu.memory_space<smem>>
    %c88 = arith.constant 88 : index
    %152 = memref.load %arg3[%c88] : memref<96xf32, #tpu.memory_space<smem>>
    %c89 = arith.constant 89 : index
    %153 = memref.load %arg3[%c89] : memref<96xf32, #tpu.memory_space<smem>>
    %c90 = arith.constant 90 : index
    %154 = memref.load %arg3[%c90] : memref<96xf32, #tpu.memory_space<smem>>
    %c91 = arith.constant 91 : index
    %155 = memref.load %arg3[%c91] : memref<96xf32, #tpu.memory_space<smem>>
    %c92 = arith.constant 92 : index
    %156 = memref.load %arg3[%c92] : memref<96xf32, #tpu.memory_space<smem>>
    %c93 = arith.constant 93 : index
    %157 = memref.load %arg3[%c93] : memref<96xf32, #tpu.memory_space<smem>>
    %c94 = arith.constant 94 : index
    %158 = memref.load %arg3[%c94] : memref<96xf32, #tpu.memory_space<smem>>
    %c95 = arith.constant 95 : index
    %159 = memref.load %arg3[%c95] : memref<96xf32, #tpu.memory_space<smem>>
    %c0_64 = arith.constant 0 : index
    %160 = memref.load %arg4[%c0_64] : memref<3xf32, #tpu.memory_space<smem>>
    %c1_65 = arith.constant 1 : index
    %161 = memref.load %arg4[%c1_65] : memref<3xf32, #tpu.memory_space<smem>>
    %c2_66 = arith.constant 2 : index
    %162 = memref.load %arg4[%c2_66] : memref<3xf32, #tpu.memory_space<smem>>
    %c0_i32 = arith.constant 0 : i32
    %c8_i32 = arith.constant 8 : i32
    %163 = arith.muli %c0_i32, %c8_i32 : i32
    %164 = tpu.assume_multiple %163, 8 : i32
    %165 = arith.index_cast %164 : i32 to index
    %c0_67 = arith.constant 0 : index
    %166 = vector.load %arg5[%165, %c0_67] : memref<8x128xf32, #tpu.memory_space<vmem>>, vector<8x128xf32>
    %167 = vector.broadcast %0 : f32 to vector<8x128xf32>
    %168 = arith.mulf %166, %167 : vector<8x128xf32>
    %169 = vector.broadcast %32 : f32 to vector<8x128xf32>
    %170 = arith.addf %168, %169 : vector<8x128xf32>
    %cst = arith.constant 0.000000e+00 : f32
    %171 = vector.broadcast %cst : f32 to vector<8x128xf32>
    %172 = arith.maximumf %170, %171 : vector<8x128xf32>
    %173 = vector.broadcast %64 : f32 to vector<8x128xf32>
    %174 = arith.mulf %172, %173 : vector<8x128xf32>
    %175 = vector.broadcast %160 : f32 to vector<8x128xf32>
    %176 = arith.addf %174, %175 : vector<8x128xf32>
    %177 = vector.broadcast %65 : f32 to vector<8x128xf32>
    %178 = arith.mulf %172, %177 : vector<8x128xf32>
    %179 = vector.broadcast %161 : f32 to vector<8x128xf32>
    %180 = arith.addf %178, %179 : vector<8x128xf32>
    %181 = vector.broadcast %66 : f32 to vector<8x128xf32>
    %182 = arith.mulf %172, %181 : vector<8x128xf32>
    %183 = vector.broadcast %162 : f32 to vector<8x128xf32>
    %184 = arith.addf %182, %183 : vector<8x128xf32>
    %185 = vector.broadcast %1 : f32 to vector<8x128xf32>
    %186 = arith.mulf %166, %185 : vector<8x128xf32>
    %187 = vector.broadcast %33 : f32 to vector<8x128xf32>
    %188 = arith.addf %186, %187 : vector<8x128xf32>
    %cst_68 = arith.constant 0.000000e+00 : f32
    %189 = vector.broadcast %cst_68 : f32 to vector<8x128xf32>
    %190 = arith.maximumf %188, %189 : vector<8x128xf32>
    %191 = vector.broadcast %67 : f32 to vector<8x128xf32>
    %192 = arith.mulf %190, %191 : vector<8x128xf32>
    %193 = arith.addf %176, %192 : vector<8x128xf32>
    %194 = vector.broadcast %68 : f32 to vector<8x128xf32>
    %195 = arith.mulf %190, %194 : vector<8x128xf32>
    %196 = arith.addf %180, %195 : vector<8x128xf32>
    %197 = vector.broadcast %69 : f32 to vector<8x128xf32>
    %198 = arith.mulf %190, %197 : vector<8x128xf32>
    %199 = arith.addf %184, %198 : vector<8x128xf32>
    %200 = vector.broadcast %2 : f32 to vector<8x128xf32>
    %201 = arith.mulf %166, %200 : vector<8x128xf32>
    %202 = vector.broadcast %34 : f32 to vector<8x128xf32>
    %203 = arith.addf %201, %202 : vector<8x128xf32>
    %cst_69 = arith.constant 0.000000e+00 : f32
    %204 = vector.broadcast %cst_69 : f32 to vector<8x128xf32>
    %205 = arith.maximumf %203, %204 : vector<8x128xf32>
    %206 = vector.broadcast %70 : f32 to vector<8x128xf32>
    %207 = arith.mulf %205, %206 : vector<8x128xf32>
    %208 = arith.addf %193, %207 : vector<8x128xf32>
    %209 = vector.broadcast %71 : f32 to vector<8x128xf32>
    %210 = arith.mulf %205, %209 : vector<8x128xf32>
    %211 = arith.addf %196, %210 : vector<8x128xf32>
    %212 = vector.broadcast %72 : f32 to vector<8x128xf32>
    %213 = arith.mulf %205, %212 : vector<8x128xf32>
    %214 = arith.addf %199, %213 : vector<8x128xf32>
    %215 = vector.broadcast %3 : f32 to vector<8x128xf32>
    %216 = arith.mulf %166, %215 : vector<8x128xf32>
    %217 = vector.broadcast %35 : f32 to vector<8x128xf32>
    %218 = arith.addf %216, %217 : vector<8x128xf32>
    %cst_70 = arith.constant 0.000000e+00 : f32
    %219 = vector.broadcast %cst_70 : f32 to vector<8x128xf32>
    %220 = arith.maximumf %218, %219 : vector<8x128xf32>
    %221 = vector.broadcast %73 : f32 to vector<8x128xf32>
    %222 = arith.mulf %220, %221 : vector<8x128xf32>
    %223 = arith.addf %208, %222 : vector<8x128xf32>
    %224 = vector.broadcast %74 : f32 to vector<8x128xf32>
    %225 = arith.mulf %220, %224 : vector<8x128xf32>
    %226 = arith.addf %211, %225 : vector<8x128xf32>
    %227 = vector.broadcast %75 : f32 to vector<8x128xf32>
    %228 = arith.mulf %220, %227 : vector<8x128xf32>
    %229 = arith.addf %214, %228 : vector<8x128xf32>
    %230 = vector.broadcast %4 : f32 to vector<8x128xf32>
    %231 = arith.mulf %166, %230 : vector<8x128xf32>
    %232 = vector.broadcast %36 : f32 to vector<8x128xf32>
    %233 = arith.addf %231, %232 : vector<8x128xf32>
    %cst_71 = arith.constant 0.000000e+00 : f32
    %234 = vector.broadcast %cst_71 : f32 to vector<8x128xf32>
    %235 = arith.maximumf %233, %234 : vector<8x128xf32>
    %236 = vector.broadcast %76 : f32 to vector<8x128xf32>
    %237 = arith.mulf %235, %236 : vector<8x128xf32>
    %238 = arith.addf %223, %237 : vector<8x128xf32>
    %239 = vector.broadcast %77 : f32 to vector<8x128xf32>
    %240 = arith.mulf %235, %239 : vector<8x128xf32>
    %241 = arith.addf %226, %240 : vector<8x128xf32>
    %242 = vector.broadcast %78 : f32 to vector<8x128xf32>
    %243 = arith.mulf %235, %242 : vector<8x128xf32>
    %244 = arith.addf %229, %243 : vector<8x128xf32>
    %245 = vector.broadcast %5 : f32 to vector<8x128xf32>
    %246 = arith.mulf %166, %245 : vector<8x128xf32>
    %247 = vector.broadcast %37 : f32 to vector<8x128xf32>
    %248 = arith.addf %246, %247 : vector<8x128xf32>
    %cst_72 = arith.constant 0.000000e+00 : f32
    %249 = vector.broadcast %cst_72 : f32 to vector<8x128xf32>
    %250 = arith.maximumf %248, %249 : vector<8x128xf32>
    %251 = vector.broadcast %79 : f32 to vector<8x128xf32>
    %252 = arith.mulf %250, %251 : vector<8x128xf32>
    %253 = arith.addf %238, %252 : vector<8x128xf32>
    %254 = vector.broadcast %80 : f32 to vector<8x128xf32>
    %255 = arith.mulf %250, %254 : vector<8x128xf32>
    %256 = arith.addf %241, %255 : vector<8x128xf32>
    %257 = vector.broadcast %81 : f32 to vector<8x128xf32>
    %258 = arith.mulf %250, %257 : vector<8x128xf32>
    %259 = arith.addf %244, %258 : vector<8x128xf32>
    %260 = vector.broadcast %6 : f32 to vector<8x128xf32>
    %261 = arith.mulf %166, %260 : vector<8x128xf32>
    %262 = vector.broadcast %38 : f32 to vector<8x128xf32>
    %263 = arith.addf %261, %262 : vector<8x128xf32>
    %cst_73 = arith.constant 0.000000e+00 : f32
    %264 = vector.broadcast %cst_73 : f32 to vector<8x128xf32>
    %265 = arith.maximumf %263, %264 : vector<8x128xf32>
    %266 = vector.broadcast %82 : f32 to vector<8x128xf32>
    %267 = arith.mulf %265, %266 : vector<8x128xf32>
    %268 = arith.addf %253, %267 : vector<8x128xf32>
    %269 = vector.broadcast %83 : f32 to vector<8x128xf32>
    %270 = arith.mulf %265, %269 : vector<8x128xf32>
    %271 = arith.addf %256, %270 : vector<8x128xf32>
    %272 = vector.broadcast %84 : f32 to vector<8x128xf32>
    %273 = arith.mulf %265, %272 : vector<8x128xf32>
    %274 = arith.addf %259, %273 : vector<8x128xf32>
    %275 = vector.broadcast %7 : f32 to vector<8x128xf32>
    %276 = arith.mulf %166, %275 : vector<8x128xf32>
    %277 = vector.broadcast %39 : f32 to vector<8x128xf32>
    %278 = arith.addf %276, %277 : vector<8x128xf32>
    %cst_74 = arith.constant 0.000000e+00 : f32
    %279 = vector.broadcast %cst_74 : f32 to vector<8x128xf32>
    %280 = arith.maximumf %278, %279 : vector<8x128xf32>
    %281 = vector.broadcast %85 : f32 to vector<8x128xf32>
    %282 = arith.mulf %280, %281 : vector<8x128xf32>
    %283 = arith.addf %268, %282 : vector<8x128xf32>
    %284 = vector.broadcast %86 : f32 to vector<8x128xf32>
    %285 = arith.mulf %280, %284 : vector<8x128xf32>
    %286 = arith.addf %271, %285 : vector<8x128xf32>
    %287 = vector.broadcast %87 : f32 to vector<8x128xf32>
    %288 = arith.mulf %280, %287 : vector<8x128xf32>
    %289 = arith.addf %274, %288 : vector<8x128xf32>
    %290 = vector.broadcast %8 : f32 to vector<8x128xf32>
    %291 = arith.mulf %166, %290 : vector<8x128xf32>
    %292 = vector.broadcast %40 : f32 to vector<8x128xf32>
    %293 = arith.addf %291, %292 : vector<8x128xf32>
    %cst_75 = arith.constant 0.000000e+00 : f32
    %294 = vector.broadcast %cst_75 : f32 to vector<8x128xf32>
    %295 = arith.maximumf %293, %294 : vector<8x128xf32>
    %296 = vector.broadcast %88 : f32 to vector<8x128xf32>
    %297 = arith.mulf %295, %296 : vector<8x128xf32>
    %298 = arith.addf %283, %297 : vector<8x128xf32>
    %299 = vector.broadcast %89 : f32 to vector<8x128xf32>
    %300 = arith.mulf %295, %299 : vector<8x128xf32>
    %301 = arith.addf %286, %300 : vector<8x128xf32>
    %302 = vector.broadcast %90 : f32 to vector<8x128xf32>
    %303 = arith.mulf %295, %302 : vector<8x128xf32>
    %304 = arith.addf %289, %303 : vector<8x128xf32>
    %305 = vector.broadcast %9 : f32 to vector<8x128xf32>
    %306 = arith.mulf %166, %305 : vector<8x128xf32>
    %307 = vector.broadcast %41 : f32 to vector<8x128xf32>
    %308 = arith.addf %306, %307 : vector<8x128xf32>
    %cst_76 = arith.constant 0.000000e+00 : f32
    %309 = vector.broadcast %cst_76 : f32 to vector<8x128xf32>
    %310 = arith.maximumf %308, %309 : vector<8x128xf32>
    %311 = vector.broadcast %91 : f32 to vector<8x128xf32>
    %312 = arith.mulf %310, %311 : vector<8x128xf32>
    %313 = arith.addf %298, %312 : vector<8x128xf32>
    %314 = vector.broadcast %92 : f32 to vector<8x128xf32>
    %315 = arith.mulf %310, %314 : vector<8x128xf32>
    %316 = arith.addf %301, %315 : vector<8x128xf32>
    %317 = vector.broadcast %93 : f32 to vector<8x128xf32>
    %318 = arith.mulf %310, %317 : vector<8x128xf32>
    %319 = arith.addf %304, %318 : vector<8x128xf32>
    %320 = vector.broadcast %10 : f32 to vector<8x128xf32>
    %321 = arith.mulf %166, %320 : vector<8x128xf32>
    %322 = vector.broadcast %42 : f32 to vector<8x128xf32>
    %323 = arith.addf %321, %322 : vector<8x128xf32>
    %cst_77 = arith.constant 0.000000e+00 : f32
    %324 = vector.broadcast %cst_77 : f32 to vector<8x128xf32>
    %325 = arith.maximumf %323, %324 : vector<8x128xf32>
    %326 = vector.broadcast %94 : f32 to vector<8x128xf32>
    %327 = arith.mulf %325, %326 : vector<8x128xf32>
    %328 = arith.addf %313, %327 : vector<8x128xf32>
    %329 = vector.broadcast %95 : f32 to vector<8x128xf32>
    %330 = arith.mulf %325, %329 : vector<8x128xf32>
    %331 = arith.addf %316, %330 : vector<8x128xf32>
    %332 = vector.broadcast %96 : f32 to vector<8x128xf32>
    %333 = arith.mulf %325, %332 : vector<8x128xf32>
    %334 = arith.addf %319, %333 : vector<8x128xf32>
    %335 = vector.broadcast %11 : f32 to vector<8x128xf32>
    %336 = arith.mulf %166, %335 : vector<8x128xf32>
    %337 = vector.broadcast %43 : f32 to vector<8x128xf32>
    %338 = arith.addf %336, %337 : vector<8x128xf32>
    %cst_78 = arith.constant 0.000000e+00 : f32
    %339 = vector.broadcast %cst_78 : f32 to vector<8x128xf32>
    %340 = arith.maximumf %338, %339 : vector<8x128xf32>
    %341 = vector.broadcast %97 : f32 to vector<8x128xf32>
    %342 = arith.mulf %340, %341 : vector<8x128xf32>
    %343 = arith.addf %328, %342 : vector<8x128xf32>
    %344 = vector.broadcast %98 : f32 to vector<8x128xf32>
    %345 = arith.mulf %340, %344 : vector<8x128xf32>
    %346 = arith.addf %331, %345 : vector<8x128xf32>
    %347 = vector.broadcast %99 : f32 to vector<8x128xf32>
    %348 = arith.mulf %340, %347 : vector<8x128xf32>
    %349 = arith.addf %334, %348 : vector<8x128xf32>
    %350 = vector.broadcast %12 : f32 to vector<8x128xf32>
    %351 = arith.mulf %166, %350 : vector<8x128xf32>
    %352 = vector.broadcast %44 : f32 to vector<8x128xf32>
    %353 = arith.addf %351, %352 : vector<8x128xf32>
    %cst_79 = arith.constant 0.000000e+00 : f32
    %354 = vector.broadcast %cst_79 : f32 to vector<8x128xf32>
    %355 = arith.maximumf %353, %354 : vector<8x128xf32>
    %356 = vector.broadcast %100 : f32 to vector<8x128xf32>
    %357 = arith.mulf %355, %356 : vector<8x128xf32>
    %358 = arith.addf %343, %357 : vector<8x128xf32>
    %359 = vector.broadcast %101 : f32 to vector<8x128xf32>
    %360 = arith.mulf %355, %359 : vector<8x128xf32>
    %361 = arith.addf %346, %360 : vector<8x128xf32>
    %362 = vector.broadcast %102 : f32 to vector<8x128xf32>
    %363 = arith.mulf %355, %362 : vector<8x128xf32>
    %364 = arith.addf %349, %363 : vector<8x128xf32>
    %365 = vector.broadcast %13 : f32 to vector<8x128xf32>
    %366 = arith.mulf %166, %365 : vector<8x128xf32>
    %367 = vector.broadcast %45 : f32 to vector<8x128xf32>
    %368 = arith.addf %366, %367 : vector<8x128xf32>
    %cst_80 = arith.constant 0.000000e+00 : f32
    %369 = vector.broadcast %cst_80 : f32 to vector<8x128xf32>
    %370 = arith.maximumf %368, %369 : vector<8x128xf32>
    %371 = vector.broadcast %103 : f32 to vector<8x128xf32>
    %372 = arith.mulf %370, %371 : vector<8x128xf32>
    %373 = arith.addf %358, %372 : vector<8x128xf32>
    %374 = vector.broadcast %104 : f32 to vector<8x128xf32>
    %375 = arith.mulf %370, %374 : vector<8x128xf32>
    %376 = arith.addf %361, %375 : vector<8x128xf32>
    %377 = vector.broadcast %105 : f32 to vector<8x128xf32>
    %378 = arith.mulf %370, %377 : vector<8x128xf32>
    %379 = arith.addf %364, %378 : vector<8x128xf32>
    %380 = vector.broadcast %14 : f32 to vector<8x128xf32>
    %381 = arith.mulf %166, %380 : vector<8x128xf32>
    %382 = vector.broadcast %46 : f32 to vector<8x128xf32>
    %383 = arith.addf %381, %382 : vector<8x128xf32>
    %cst_81 = arith.constant 0.000000e+00 : f32
    %384 = vector.broadcast %cst_81 : f32 to vector<8x128xf32>
    %385 = arith.maximumf %383, %384 : vector<8x128xf32>
    %386 = vector.broadcast %106 : f32 to vector<8x128xf32>
    %387 = arith.mulf %385, %386 : vector<8x128xf32>
    %388 = arith.addf %373, %387 : vector<8x128xf32>
    %389 = vector.broadcast %107 : f32 to vector<8x128xf32>
    %390 = arith.mulf %385, %389 : vector<8x128xf32>
    %391 = arith.addf %376, %390 : vector<8x128xf32>
    %392 = vector.broadcast %108 : f32 to vector<8x128xf32>
    %393 = arith.mulf %385, %392 : vector<8x128xf32>
    %394 = arith.addf %379, %393 : vector<8x128xf32>
    %395 = vector.broadcast %15 : f32 to vector<8x128xf32>
    %396 = arith.mulf %166, %395 : vector<8x128xf32>
    %397 = vector.broadcast %47 : f32 to vector<8x128xf32>
    %398 = arith.addf %396, %397 : vector<8x128xf32>
    %cst_82 = arith.constant 0.000000e+00 : f32
    %399 = vector.broadcast %cst_82 : f32 to vector<8x128xf32>
    %400 = arith.maximumf %398, %399 : vector<8x128xf32>
    %401 = vector.broadcast %109 : f32 to vector<8x128xf32>
    %402 = arith.mulf %400, %401 : vector<8x128xf32>
    %403 = arith.addf %388, %402 : vector<8x128xf32>
    %404 = vector.broadcast %110 : f32 to vector<8x128xf32>
    %405 = arith.mulf %400, %404 : vector<8x128xf32>
    %406 = arith.addf %391, %405 : vector<8x128xf32>
    %407 = vector.broadcast %111 : f32 to vector<8x128xf32>
    %408 = arith.mulf %400, %407 : vector<8x128xf32>
    %409 = arith.addf %394, %408 : vector<8x128xf32>
    %410 = vector.broadcast %16 : f32 to vector<8x128xf32>
    %411 = arith.mulf %166, %410 : vector<8x128xf32>
    %412 = vector.broadcast %48 : f32 to vector<8x128xf32>
    %413 = arith.addf %411, %412 : vector<8x128xf32>
    %cst_83 = arith.constant 0.000000e+00 : f32
    %414 = vector.broadcast %cst_83 : f32 to vector<8x128xf32>
    %415 = arith.maximumf %413, %414 : vector<8x128xf32>
    %416 = vector.broadcast %112 : f32 to vector<8x128xf32>
    %417 = arith.mulf %415, %416 : vector<8x128xf32>
    %418 = arith.addf %403, %417 : vector<8x128xf32>
    %419 = vector.broadcast %113 : f32 to vector<8x128xf32>
    %420 = arith.mulf %415, %419 : vector<8x128xf32>
    %421 = arith.addf %406, %420 : vector<8x128xf32>
    %422 = vector.broadcast %114 : f32 to vector<8x128xf32>
    %423 = arith.mulf %415, %422 : vector<8x128xf32>
    %424 = arith.addf %409, %423 : vector<8x128xf32>
    %425 = vector.broadcast %17 : f32 to vector<8x128xf32>
    %426 = arith.mulf %166, %425 : vector<8x128xf32>
    %427 = vector.broadcast %49 : f32 to vector<8x128xf32>
    %428 = arith.addf %426, %427 : vector<8x128xf32>
    %cst_84 = arith.constant 0.000000e+00 : f32
    %429 = vector.broadcast %cst_84 : f32 to vector<8x128xf32>
    %430 = arith.maximumf %428, %429 : vector<8x128xf32>
    %431 = vector.broadcast %115 : f32 to vector<8x128xf32>
    %432 = arith.mulf %430, %431 : vector<8x128xf32>
    %433 = arith.addf %418, %432 : vector<8x128xf32>
    %434 = vector.broadcast %116 : f32 to vector<8x128xf32>
    %435 = arith.mulf %430, %434 : vector<8x128xf32>
    %436 = arith.addf %421, %435 : vector<8x128xf32>
    %437 = vector.broadcast %117 : f32 to vector<8x128xf32>
    %438 = arith.mulf %430, %437 : vector<8x128xf32>
    %439 = arith.addf %424, %438 : vector<8x128xf32>
    %440 = vector.broadcast %18 : f32 to vector<8x128xf32>
    %441 = arith.mulf %166, %440 : vector<8x128xf32>
    %442 = vector.broadcast %50 : f32 to vector<8x128xf32>
    %443 = arith.addf %441, %442 : vector<8x128xf32>
    %cst_85 = arith.constant 0.000000e+00 : f32
    %444 = vector.broadcast %cst_85 : f32 to vector<8x128xf32>
    %445 = arith.maximumf %443, %444 : vector<8x128xf32>
    %446 = vector.broadcast %118 : f32 to vector<8x128xf32>
    %447 = arith.mulf %445, %446 : vector<8x128xf32>
    %448 = arith.addf %433, %447 : vector<8x128xf32>
    %449 = vector.broadcast %119 : f32 to vector<8x128xf32>
    %450 = arith.mulf %445, %449 : vector<8x128xf32>
    %451 = arith.addf %436, %450 : vector<8x128xf32>
    %452 = vector.broadcast %120 : f32 to vector<8x128xf32>
    %453 = arith.mulf %445, %452 : vector<8x128xf32>
    %454 = arith.addf %439, %453 : vector<8x128xf32>
    %455 = vector.broadcast %19 : f32 to vector<8x128xf32>
    %456 = arith.mulf %166, %455 : vector<8x128xf32>
    %457 = vector.broadcast %51 : f32 to vector<8x128xf32>
    %458 = arith.addf %456, %457 : vector<8x128xf32>
    %cst_86 = arith.constant 0.000000e+00 : f32
    %459 = vector.broadcast %cst_86 : f32 to vector<8x128xf32>
    %460 = arith.maximumf %458, %459 : vector<8x128xf32>
    %461 = vector.broadcast %121 : f32 to vector<8x128xf32>
    %462 = arith.mulf %460, %461 : vector<8x128xf32>
    %463 = arith.addf %448, %462 : vector<8x128xf32>
    %464 = vector.broadcast %122 : f32 to vector<8x128xf32>
    %465 = arith.mulf %460, %464 : vector<8x128xf32>
    %466 = arith.addf %451, %465 : vector<8x128xf32>
    %467 = vector.broadcast %123 : f32 to vector<8x128xf32>
    %468 = arith.mulf %460, %467 : vector<8x128xf32>
    %469 = arith.addf %454, %468 : vector<8x128xf32>
    %470 = vector.broadcast %20 : f32 to vector<8x128xf32>
    %471 = arith.mulf %166, %470 : vector<8x128xf32>
    %472 = vector.broadcast %52 : f32 to vector<8x128xf32>
    %473 = arith.addf %471, %472 : vector<8x128xf32>
    %cst_87 = arith.constant 0.000000e+00 : f32
    %474 = vector.broadcast %cst_87 : f32 to vector<8x128xf32>
    %475 = arith.maximumf %473, %474 : vector<8x128xf32>
    %476 = vector.broadcast %124 : f32 to vector<8x128xf32>
    %477 = arith.mulf %475, %476 : vector<8x128xf32>
    %478 = arith.addf %463, %477 : vector<8x128xf32>
    %479 = vector.broadcast %125 : f32 to vector<8x128xf32>
    %480 = arith.mulf %475, %479 : vector<8x128xf32>
    %481 = arith.addf %466, %480 : vector<8x128xf32>
    %482 = vector.broadcast %126 : f32 to vector<8x128xf32>
    %483 = arith.mulf %475, %482 : vector<8x128xf32>
    %484 = arith.addf %469, %483 : vector<8x128xf32>
    %485 = vector.broadcast %21 : f32 to vector<8x128xf32>
    %486 = arith.mulf %166, %485 : vector<8x128xf32>
    %487 = vector.broadcast %53 : f32 to vector<8x128xf32>
    %488 = arith.addf %486, %487 : vector<8x128xf32>
    %cst_88 = arith.constant 0.000000e+00 : f32
    %489 = vector.broadcast %cst_88 : f32 to vector<8x128xf32>
    %490 = arith.maximumf %488, %489 : vector<8x128xf32>
    %491 = vector.broadcast %127 : f32 to vector<8x128xf32>
    %492 = arith.mulf %490, %491 : vector<8x128xf32>
    %493 = arith.addf %478, %492 : vector<8x128xf32>
    %494 = vector.broadcast %128 : f32 to vector<8x128xf32>
    %495 = arith.mulf %490, %494 : vector<8x128xf32>
    %496 = arith.addf %481, %495 : vector<8x128xf32>
    %497 = vector.broadcast %129 : f32 to vector<8x128xf32>
    %498 = arith.mulf %490, %497 : vector<8x128xf32>
    %499 = arith.addf %484, %498 : vector<8x128xf32>
    %500 = vector.broadcast %22 : f32 to vector<8x128xf32>
    %501 = arith.mulf %166, %500 : vector<8x128xf32>
    %502 = vector.broadcast %54 : f32 to vector<8x128xf32>
    %503 = arith.addf %501, %502 : vector<8x128xf32>
    %cst_89 = arith.constant 0.000000e+00 : f32
    %504 = vector.broadcast %cst_89 : f32 to vector<8x128xf32>
    %505 = arith.maximumf %503, %504 : vector<8x128xf32>
    %506 = vector.broadcast %130 : f32 to vector<8x128xf32>
    %507 = arith.mulf %505, %506 : vector<8x128xf32>
    %508 = arith.addf %493, %507 : vector<8x128xf32>
    %509 = vector.broadcast %131 : f32 to vector<8x128xf32>
    %510 = arith.mulf %505, %509 : vector<8x128xf32>
    %511 = arith.addf %496, %510 : vector<8x128xf32>
    %512 = vector.broadcast %132 : f32 to vector<8x128xf32>
    %513 = arith.mulf %505, %512 : vector<8x128xf32>
    %514 = arith.addf %499, %513 : vector<8x128xf32>
    %515 = vector.broadcast %23 : f32 to vector<8x128xf32>
    %516 = arith.mulf %166, %515 : vector<8x128xf32>
    %517 = vector.broadcast %55 : f32 to vector<8x128xf32>
    %518 = arith.addf %516, %517 : vector<8x128xf32>
    %cst_90 = arith.constant 0.000000e+00 : f32
    %519 = vector.broadcast %cst_90 : f32 to vector<8x128xf32>
    %520 = arith.maximumf %518, %519 : vector<8x128xf32>
    %521 = vector.broadcast %133 : f32 to vector<8x128xf32>
    %522 = arith.mulf %520, %521 : vector<8x128xf32>
    %523 = arith.addf %508, %522 : vector<8x128xf32>
    %524 = vector.broadcast %134 : f32 to vector<8x128xf32>
    %525 = arith.mulf %520, %524 : vector<8x128xf32>
    %526 = arith.addf %511, %525 : vector<8x128xf32>
    %527 = vector.broadcast %135 : f32 to vector<8x128xf32>
    %528 = arith.mulf %520, %527 : vector<8x128xf32>
    %529 = arith.addf %514, %528 : vector<8x128xf32>
    %530 = vector.broadcast %24 : f32 to vector<8x128xf32>
    %531 = arith.mulf %166, %530 : vector<8x128xf32>
    %532 = vector.broadcast %56 : f32 to vector<8x128xf32>
    %533 = arith.addf %531, %532 : vector<8x128xf32>
    %cst_91 = arith.constant 0.000000e+00 : f32
    %534 = vector.broadcast %cst_91 : f32 to vector<8x128xf32>
    %535 = arith.maximumf %533, %534 : vector<8x128xf32>
    %536 = vector.broadcast %136 : f32 to vector<8x128xf32>
    %537 = arith.mulf %535, %536 : vector<8x128xf32>
    %538 = arith.addf %523, %537 : vector<8x128xf32>
    %539 = vector.broadcast %137 : f32 to vector<8x128xf32>
    %540 = arith.mulf %535, %539 : vector<8x128xf32>
    %541 = arith.addf %526, %540 : vector<8x128xf32>
    %542 = vector.broadcast %138 : f32 to vector<8x128xf32>
    %543 = arith.mulf %535, %542 : vector<8x128xf32>
    %544 = arith.addf %529, %543 : vector<8x128xf32>
    %545 = vector.broadcast %25 : f32 to vector<8x128xf32>
    %546 = arith.mulf %166, %545 : vector<8x128xf32>
    %547 = vector.broadcast %57 : f32 to vector<8x128xf32>
    %548 = arith.addf %546, %547 : vector<8x128xf32>
    %cst_92 = arith.constant 0.000000e+00 : f32
    %549 = vector.broadcast %cst_92 : f32 to vector<8x128xf32>
    %550 = arith.maximumf %548, %549 : vector<8x128xf32>
    %551 = vector.broadcast %139 : f32 to vector<8x128xf32>
    %552 = arith.mulf %550, %551 : vector<8x128xf32>
    %553 = arith.addf %538, %552 : vector<8x128xf32>
    %554 = vector.broadcast %140 : f32 to vector<8x128xf32>
    %555 = arith.mulf %550, %554 : vector<8x128xf32>
    %556 = arith.addf %541, %555 : vector<8x128xf32>
    %557 = vector.broadcast %141 : f32 to vector<8x128xf32>
    %558 = arith.mulf %550, %557 : vector<8x128xf32>
    %559 = arith.addf %544, %558 : vector<8x128xf32>
    %560 = vector.broadcast %26 : f32 to vector<8x128xf32>
    %561 = arith.mulf %166, %560 : vector<8x128xf32>
    %562 = vector.broadcast %58 : f32 to vector<8x128xf32>
    %563 = arith.addf %561, %562 : vector<8x128xf32>
    %cst_93 = arith.constant 0.000000e+00 : f32
    %564 = vector.broadcast %cst_93 : f32 to vector<8x128xf32>
    %565 = arith.maximumf %563, %564 : vector<8x128xf32>
    %566 = vector.broadcast %142 : f32 to vector<8x128xf32>
    %567 = arith.mulf %565, %566 : vector<8x128xf32>
    %568 = arith.addf %553, %567 : vector<8x128xf32>
    %569 = vector.broadcast %143 : f32 to vector<8x128xf32>
    %570 = arith.mulf %565, %569 : vector<8x128xf32>
    %571 = arith.addf %556, %570 : vector<8x128xf32>
    %572 = vector.broadcast %144 : f32 to vector<8x128xf32>
    %573 = arith.mulf %565, %572 : vector<8x128xf32>
    %574 = arith.addf %559, %573 : vector<8x128xf32>
    %575 = vector.broadcast %27 : f32 to vector<8x128xf32>
    %576 = arith.mulf %166, %575 : vector<8x128xf32>
    %577 = vector.broadcast %59 : f32 to vector<8x128xf32>
    %578 = arith.addf %576, %577 : vector<8x128xf32>
    %cst_94 = arith.constant 0.000000e+00 : f32
    %579 = vector.broadcast %cst_94 : f32 to vector<8x128xf32>
    %580 = arith.maximumf %578, %579 : vector<8x128xf32>
    %581 = vector.broadcast %145 : f32 to vector<8x128xf32>
    %582 = arith.mulf %580, %581 : vector<8x128xf32>
    %583 = arith.addf %568, %582 : vector<8x128xf32>
    %584 = vector.broadcast %146 : f32 to vector<8x128xf32>
    %585 = arith.mulf %580, %584 : vector<8x128xf32>
    %586 = arith.addf %571, %585 : vector<8x128xf32>
    %587 = vector.broadcast %147 : f32 to vector<8x128xf32>
    %588 = arith.mulf %580, %587 : vector<8x128xf32>
    %589 = arith.addf %574, %588 : vector<8x128xf32>
    %590 = vector.broadcast %28 : f32 to vector<8x128xf32>
    %591 = arith.mulf %166, %590 : vector<8x128xf32>
    %592 = vector.broadcast %60 : f32 to vector<8x128xf32>
    %593 = arith.addf %591, %592 : vector<8x128xf32>
    %cst_95 = arith.constant 0.000000e+00 : f32
    %594 = vector.broadcast %cst_95 : f32 to vector<8x128xf32>
    %595 = arith.maximumf %593, %594 : vector<8x128xf32>
    %596 = vector.broadcast %148 : f32 to vector<8x128xf32>
    %597 = arith.mulf %595, %596 : vector<8x128xf32>
    %598 = arith.addf %583, %597 : vector<8x128xf32>
    %599 = vector.broadcast %149 : f32 to vector<8x128xf32>
    %600 = arith.mulf %595, %599 : vector<8x128xf32>
    %601 = arith.addf %586, %600 : vector<8x128xf32>
    %602 = vector.broadcast %150 : f32 to vector<8x128xf32>
    %603 = arith.mulf %595, %602 : vector<8x128xf32>
    %604 = arith.addf %589, %603 : vector<8x128xf32>
    %605 = vector.broadcast %29 : f32 to vector<8x128xf32>
    %606 = arith.mulf %166, %605 : vector<8x128xf32>
    %607 = vector.broadcast %61 : f32 to vector<8x128xf32>
    %608 = arith.addf %606, %607 : vector<8x128xf32>
    %cst_96 = arith.constant 0.000000e+00 : f32
    %609 = vector.broadcast %cst_96 : f32 to vector<8x128xf32>
    %610 = arith.maximumf %608, %609 : vector<8x128xf32>
    %611 = vector.broadcast %151 : f32 to vector<8x128xf32>
    %612 = arith.mulf %610, %611 : vector<8x128xf32>
    %613 = arith.addf %598, %612 : vector<8x128xf32>
    %614 = vector.broadcast %152 : f32 to vector<8x128xf32>
    %615 = arith.mulf %610, %614 : vector<8x128xf32>
    %616 = arith.addf %601, %615 : vector<8x128xf32>
    %617 = vector.broadcast %153 : f32 to vector<8x128xf32>
    %618 = arith.mulf %610, %617 : vector<8x128xf32>
    %619 = arith.addf %604, %618 : vector<8x128xf32>
    %620 = vector.broadcast %30 : f32 to vector<8x128xf32>
    %621 = arith.mulf %166, %620 : vector<8x128xf32>
    %622 = vector.broadcast %62 : f32 to vector<8x128xf32>
    %623 = arith.addf %621, %622 : vector<8x128xf32>
    %cst_97 = arith.constant 0.000000e+00 : f32
    %624 = vector.broadcast %cst_97 : f32 to vector<8x128xf32>
    %625 = arith.maximumf %623, %624 : vector<8x128xf32>
    %626 = vector.broadcast %154 : f32 to vector<8x128xf32>
    %627 = arith.mulf %625, %626 : vector<8x128xf32>
    %628 = arith.addf %613, %627 : vector<8x128xf32>
    %629 = vector.broadcast %155 : f32 to vector<8x128xf32>
    %630 = arith.mulf %625, %629 : vector<8x128xf32>
    %631 = arith.addf %616, %630 : vector<8x128xf32>
    %632 = vector.broadcast %156 : f32 to vector<8x128xf32>
    %633 = arith.mulf %625, %632 : vector<8x128xf32>
    %634 = arith.addf %619, %633 : vector<8x128xf32>
    %635 = vector.broadcast %31 : f32 to vector<8x128xf32>
    %636 = arith.mulf %166, %635 : vector<8x128xf32>
    %637 = vector.broadcast %63 : f32 to vector<8x128xf32>
    %638 = arith.addf %636, %637 : vector<8x128xf32>
    %cst_98 = arith.constant 0.000000e+00 : f32
    %639 = vector.broadcast %cst_98 : f32 to vector<8x128xf32>
    %640 = arith.maximumf %638, %639 : vector<8x128xf32>
    %641 = vector.broadcast %157 : f32 to vector<8x128xf32>
    %642 = arith.mulf %640, %641 : vector<8x128xf32>
    %643 = arith.addf %628, %642 : vector<8x128xf32>
    %644 = vector.broadcast %158 : f32 to vector<8x128xf32>
    %645 = arith.mulf %640, %644 : vector<8x128xf32>
    %646 = arith.addf %631, %645 : vector<8x128xf32>
    %647 = vector.broadcast %159 : f32 to vector<8x128xf32>
    %648 = arith.mulf %640, %647 : vector<8x128xf32>
    %649 = arith.addf %634, %648 : vector<8x128xf32>
    %c0_99 = arith.constant 0 : index
    %650 = arith.index_cast %164 : i32 to index
    %c0_100 = arith.constant 0 : index
    %651 = vector.load %arg6[%c0_99, %650, %c0_100] : memref<3x8x128xf32, #tpu.memory_space<vmem>>, vector<1x8x128xf32>
    %652 = vector.shape_cast %651 : vector<1x8x128xf32> to vector<8x128xf32>
    %653 = vector.shape_cast %643 : vector<8x128xf32> to vector<1x8x128xf32>
    tpu.vector_store %arg6[%c0_99, %650, %c0_100], %653 {strides = array<i32>} : memref<3x8x128xf32, #tpu.memory_space<vmem>>, vector<1x8x128xf32>,
    %c1_101 = arith.constant 1 : index
    %654 = arith.index_cast %164 : i32 to index
    %c0_102 = arith.constant 0 : index
    %655 = vector.load %arg6[%c1_101, %654, %c0_102] : memref<3x8x128xf32, #tpu.memory_space<vmem>>, vector<1x8x128xf32>
    %656 = vector.shape_cast %655 : vector<1x8x128xf32> to vector<8x128xf32>
    %657 = vector.shape_cast %646 : vector<8x128xf32> to vector<1x8x128xf32>
    tpu.vector_store %arg6[%c1_101, %654, %c0_102], %657 {strides = array<i32>} : memref<3x8x128xf32, #tpu.memory_space<vmem>>, vector<1x8x128xf32>,
    %c2_103 = arith.constant 2 : index
    %658 = arith.index_cast %164 : i32 to index
    %c0_104 = arith.constant 0 : index
    %659 = vector.load %arg6[%c2_103, %658, %c0_104] : memref<3x8x128xf32, #tpu.memory_space<vmem>>, vector<1x8x128xf32>
    %660 = vector.shape_cast %659 : vector<1x8x128xf32> to vector<8x128xf32>
    %661 = vector.shape_cast %649 : vector<8x128xf32> to vector<1x8x128xf32>
    tpu.vector_store %arg6[%c2_103, %658, %c0_104], %661 {strides = array<i32>} : memref<3x8x128xf32, #tpu.memory_space<vmem>>, vector<1x8x128xf32>,
    %c1_i32 = arith.constant 1 : i32
    return
  }
  func.func @transform_0(%arg0: i32) -> i32 {
    %c0_i32 = arith.constant 0 : i32
    %c0_i32_0 = arith.constant 0 : i32
    return %c0_i32 : i32
  }
  func.func @transform_1(%arg0: i32) -> i32 {
    %c0_i32 = arith.constant 0 : i32
    %c0_i32_0 = arith.constant 0 : i32
    return %c0_i32 : i32
  }
  func.func @transform_2(%arg0: i32) -> i32 {
    %c0_i32 = arith.constant 0 : i32
    %c0_i32_0 = arith.constant 0 : i32
    return %c0_i32 : i32
  }
  func.func @transform_3(%arg0: i32) -> i32 {
    %c0_i32 = arith.constant 0 : i32
    %c0_i32_0 = arith.constant 0 : i32
    return %c0_i32 : i32
  }
  func.func @transform_4(%arg0: i32) -> (i32, i32) {
    %c0_i32 = arith.constant 0 : i32
    %c0_i32_0 = arith.constant 0 : i32
    return %arg0, %c0_i32 : i32, i32
  }
  func.func @transform_5(%arg0: i32) -> (i32, i32, i32) {
    %c0_i32 = arith.constant 0 : i32
    %c0_i32_0 = arith.constant 0 : i32
    %c0_i32_1 = arith.constant 0 : i32
    return %c0_i32, %arg0, %c0_i32_0 : i32, i32, i32
  }
}

</mosaic_0001>

<bundles_post_ra>
// kernel: tpu_custom_call.1
= control target key start
LH: loop header
LB: loop body
LE: loop exit
PB: predicated region body
PF: predicated region fallthrough
CT: control target
= control target key end

     0   :  { %s1828_s0 = inlined_call_operand.hbm [shape: f32[32], index: 0, kind: input, shape index: {}]   ;;  %s1829_s1 = inlined_call_operand.vmem [shape: f32[32], index: 1, kind: input, shape index: {}]   ;;  %s1830_s2 = inlined_call_operand.vmem [shape: f32[96], index: 2, kind: input, shape index: {}]   ;;  %s1831_s3 = inlined_call_operand.vmem [shape: f32[3], index: 3, kind: input, shape index: {}]   ;;  %s1832_s4 = inlined_call_operand.hbm [shape: f32[8,128], index: 4, kind: input, shape index: {}]   ;;  %s1833_s5 = inlined_call_operand.hbm [shape: f32[3,8,128], index: 5, kind: output, shape index: {}]  }
   0x1   :  { %1834 = sst [smem:[#allocation54_spill]] %s1833_s5 }
   0x2   :  { %10 = vsyncpa [#allocation5], 0 }
   0x3   :  { %11 = vsyncpa [#allocation6], 0 }
   0x4   :  { %12 = vsyncpa [#allocation9], 0 }
   0x5   :  { %13 = vsyncpa [#allocation3], 0  ;;  %s39_s20 = sshll.u32 %s1830_s2, 4  ;;  %s40_s20 = int_to_ptr.vmem [resolvable:$true] %s39_s20 }
   0x6   :  { %14 = vsyncpa [#allocation4], 0  ;;  %s890_s21 = scalar_lea.vmem %s40_s20, 16  ;;  %p895_p1 = scmp.lt.s32.totalorder %s40_s20, %s40_s20 }
   0x7   :  { %p891_p0 = scmp.ne.s32.totalorder %s40_s20, %s890_s21  ;;  %p896_p2 = scmp.lt.s32.totalorder %s890_s21, %s890_s21 }
   0x9   :  { %p897_p3 = por %p896_p2, %p895_p1 }
   0xb   :  { %p898_p4 = pnand %p897_p3, %p891_p0 }
   0xd   :  { %901 = shalt.err (!%p898_p4)
}
   0xe   :  { %s984_s22 = smov [#allocation8]   ;;  %s985_s23 = smov [#allocation2]  }
   0xf   :  { %42 = dma.vmem_to_smem %s40_s20, 16, %s984_s22, [#allocation9]  }
  0x10   :  { %22 = dma.hbm_to_smem %s1828_s0, 16, %s985_s23, [#allocation5]  }
  0x11   :  { %s29_s2 = sshll.u32 %s1829_s1, 4  ;;  %s49_s30 = sshll.u32 %s1831_s3, 4  ;;  %s30_s2 = int_to_ptr.vmem [resolvable:$true] %s29_s2  ;;  %s50_s30 = int_to_ptr.vmem [resolvable:$true] %s49_s30 }
  0x12   :  { %s910_s6 = scalar_lea.vmem %s30_s2, 16  ;;  %p915_p6 = scmp.lt.s32.totalorder %s30_s2, %s30_s2 }
  0x13   :  { %p911_p5 = scmp.ne.s32.totalorder %s30_s2, %s910_s6  ;;  %p916_p7 = scmp.lt.s32.totalorder %s910_s6, %s910_s6 }
  0x15   :  { %p917_p8 = por %p916_p7, %p915_p6 }
  0x17   :  { %p918_p9 = pnand %p917_p8, %p911_p5 }
  0x19   :  { %921 = shalt.err (!%p918_p9)
}
  0x1a   :  { %s986_s7 = smov [#allocation7]   ;;  %s922_s0 = scalar_lea.vmem %s50_s30, 16 }
  0x1b   :  { %32 = dma.vmem_to_smem %s30_s2, 16, %s986_s7, [#allocation6]  }
  0x1c   :  { %p923_p10 = scmp.ne.s32.totalorder %s50_s30, %s922_s0  ;;  %p927_p11 = scmp.lt.s32.totalorder %s50_s30, %s50_s30 }
  0x1d   :  { %p928_p12 = scmp.lt.s32.totalorder %s922_s0, %s922_s0 }
  0x1f   :  { %p929_p13 = por %p928_p12, %p927_p11 }
  0x21   :  { %p930_p0 = pnand %p929_p13, %p923_p10 }
  0x23   :  { %933 = shalt.err (!%p930_p0)
}
  0x24   :  { %s987_s1 = smov [#allocation10]   ;;  %s988_s3 = smov [#allocation11]  }
  0x25   :  { %52 = dma.vmem_to_smem %s50_s30, 16, %s987_s1, [#allocation9]  }
  0x26   :  { %s59_s8 = sshll.u32 %s988_s3, 4  ;;  %s60_s8 = int_to_ptr.vmem [resolvable:$true] %s59_s8 }
  0x27   :  { %s942_s9 = scalar_lea.vmem %s60_s8, 128  ;;  %p947_p2 = scmp.lt.s32.totalorder %s60_s8, %s60_s8 }
  0x28   :  { %p943_p1 = scmp.ne.s32.totalorder %s60_s8, %s942_s9  ;;  %p948_p3 = scmp.lt.s32.totalorder %s942_s9, %s942_s9 }
  0x2a   :  { %p949_p4 = por %p948_p3, %p947_p2 }
  0x2c   :  { %p950_p5 = pnand %p949_p4, %p943_p1 }
  0x2e   :  { %953 = shalt.err (!%p950_p5)
}
  0x2f   :  { %62 = dma.hbm_to_vmem [thread:$0]  %s1832_s4, 128, %s60_s8, [#allocation3]  }
  0x30   :  { %974 = dma.done.wait [#allocation5], 16  }
  0x31   :  { %975 = vsyncadd [#allocation5], 4294967280 }
  0x32   :  { %976 = dma.done.wait [#allocation6], 16  }
  0x33   :  { %977 = vsyncadd [#allocation6], 4294967280 }
  0x34   :  { %978 = dma.done.wait [#allocation9], 32  }
  0x35   :  { %979 = vsyncadd [#allocation9], 4294967264 }
  0x36   :  { %980 = dma.done.wait [#allocation3], 128  }
  0x37   :  { %981 = vsyncadd [#allocation3], 4294967168 }
  0x38   :  { %78 = sfence }
  0x39   :  { %s1037_s12 = sld [smem:[#allocation2]]  ;;  %v1155_v0 = vld [vmem:[#allocation11] sm:$0xff] }
  0x3a   :  { %s1039_s13 = sld [smem:[#allocation2 + $0x1]] }
  0x3b   :  { %s1041_s14 = sld [smem:[#allocation2 + $0x2]] }
  0x3c   :  { %s1043_s15 = sld [smem:[#allocation2 + $0x3]] }
  0x3d   :  { %s1045_s16 = sld [smem:[#allocation2 + $0x4]] }
  0x3e   :  { %s1047_s4 = sld [smem:[#allocation2 + $0x5]] }
  0x3f   :  { %s1049_s17 = sld [smem:[#allocation2 + $0x6]]  ;;  %v243_v1 = vstv %s1037_s12 }
  0x40   :  { %s1051_s18 = sld [smem:[#allocation2 + $0x7]]  ;;  %v260_v2 = vstv %s1039_s13  ;;  %v244_v7 = vmul.f32 %v243_v1, %v1155_v0 }
  0x41   :  { %s1053_s19 = sld [smem:[#allocation2 + $0x8]]  ;;  %v274_v3 = vstv %s1041_s14  ;;  %v261_v10 = vmul.f32 %v260_v2, %v1155_v0 }
  0x42   :  { %s1055_s20 = sld [smem:[#allocation2 + $0x9]]  ;;  %v288_v4 = vstv %s1043_s15  ;;  %v275_v12 = vmul.f32 %v274_v3, %v1155_v0 }
  0x43   :  { %s1057_s21 = sld [smem:[#allocation2 + $0xa]]  ;;  %v302_v5 = vstv %s1045_s16  ;;  %v289_v14 = vmul.f32 %v288_v4, %v1155_v0 }
  0x44   :  { %s1059_s22 = sld [smem:[#allocation2 + $0xb]]  ;;  %v316_v6 = vstv %s1047_s4  ;;  %v303_v15 = vmul.f32 %v302_v5, %v1155_v0 }
  0x45   :  { %s1061_s23 = sld [smem:[#allocation2 + $0xc]]  ;;  %v330_v8 = vstv %s1049_s17  ;;  %v317_v16 = vmul.f32 %v316_v6, %v1155_v0 }
  0x46   :  { %s1063_s24 = sld [smem:[#allocation2 + $0xd]]  ;;  %v331_v20 = vmul.f32 %v330_v8, %v1155_v0  ;;  %v344_v23 = vstv %s1051_s18 }
  0x47   :  { %s1065_s25 = sld [smem:[#allocation2 + $0xe]]  ;;  %v358_v26 = vstv %s1053_s19  ;;  %v345_v31 = vmul.f32 %v344_v23, %v1155_v0 }
  0x48   :  { %s1067_s26 = sld [smem:[#allocation2 + $0xf]]  ;;  %v359_v34 = vmul.f32 %v358_v26, %v1155_v0  ;;  %v372_v38 = vstv %s1055_s20 }
  0x49   :  { %s1069_s27 = sld [smem:[#allocation2 + $0x10]]  ;;  %v386_v42 = vstv %s1057_s21  ;;  %v373_v48 = vmul.f32 %v372_v38, %v1155_v0 }
  0x4a   :  { %s1071_s2 = sld [smem:[#allocation2 + $0x11]]  ;;  %v400_v45 = vstv %s1059_s22  ;;  %v387_v52 = vmul.f32 %v386_v42, %v1155_v0 }
  0x4b   :  { %s1073_s28 = sld [smem:[#allocation2 + $0x12]]  ;;  %v414_v46 = vstv %s1061_s23  ;;  %v401_v55 = vmul.f32 %v400_v45, %v1155_v0 }
  0x4c   :  { %1835 = sst [smem:[#allocation18_spill]] %s1063_s24  ;;  %v415_v57 = vmul.f32 %v414_v46, %v1155_v0 }
  0x4d   :  { %1836 = sst [smem:[#allocation19_spill]] %s1065_s25 }
  0x4e   :  { %1837 = sst [smem:[#allocation20_spill]] %s1067_s26 }
  0x4f   :  { %1838 = sst [smem:[#allocation21_spill]] %s1069_s27 }
  0x50   :  { %1839 = sst [smem:[#allocation22_spill]] %s1071_s2 }
  0x51   :  { %1840 = sst [smem:[#allocation23_spill]] %s1073_s28 }
  0x52   :  { %s1075_s29 = sld [smem:[#allocation2 + $0x13]] }
  0x53   :  { %s1077_s30 = sld [smem:[#allocation2 + $0x14]] }
  0x54   :  { %s1079_s6 = sld [smem:[#allocation2 + $0x15]] }
  0x55   :  { %s1081_s7 = sld [smem:[#allocation2 + $0x16]] }
  0x56   :  { %s1083_s0 = sld [smem:[#allocation2 + $0x17]] }
  0x57   :  { %s1085_s1 = sld [smem:[#allocation2 + $0x18]] }
  0x58   :  { %1841 = sst [smem:[#allocation24_spill]] %s1075_s29 }
  0x59   :  { %1842 = sst [smem:[#allocation25_spill]] %s1077_s30 }
  0x5a   :  { %1843 = sst [smem:[#allocation26_spill]] %s1079_s6 }
  0x5b   :  { %1844 = sst [smem:[#allocation27_spill]] %s1081_s7 }
  0x5c   :  { %1845 = sst [smem:[#allocation28_spill]] %s1083_s0 }
  0x5d   :  { %1846 = sst [smem:[#allocation29_spill]] %s1085_s1 }
  0x5e   :  { %s1087_s3 = sld [smem:[#allocation2 + $0x19]] }
  0x5f   :  { %s1089_s8 = sld [smem:[#allocation2 + $0x1a]] }
  0x60   :  { %s1091_s9 = sld [smem:[#allocation2 + $0x1b]] }
  0x61   :  { %s1093_s10 = sld [smem:[#allocation2 + $0x1c]] }
  0x62   :  { %s1095_s11 = sld [smem:[#allocation2 + $0x1d]] }
  0x63   :  { %s1097_s5 = sld [smem:[#allocation2 + $0x1e]] }
  0x64   :  { %1847 = sst [smem:[#allocation30_spill]] %s1087_s3 }
  0x65   :  { %1848 = sst [smem:[#allocation31_spill]] %s1089_s8 }
  0x66   :  { %1849 = sst [smem:[#allocation32_spill]] %s1091_s9 }
  0x67   :  { %1850 = sst [smem:[#allocation33_spill]] %s1093_s10 }
  0x68   :  { %1851 = sst [smem:[#allocation34_spill]] %s1095_s11 }
  0x69   :  { %1852 = sst [smem:[#allocation35_spill]] %s1097_s5 }
  0x6a   :  { %s1099_s30 = sld [smem:[#allocation2 + $0x1f]] }
  0x6b   :  { %s1101_s6 = sld [smem:[#allocation7]] }
  0x6c   :  { %s1103_s7 = sld [smem:[#allocation7 + $0x1]] }
  0x6d   :  { %s1105_s0 = sld [smem:[#allocation7 + $0x2]] }
  0x6e   :  { %s1107_s1 = sld [smem:[#allocation7 + $0x3]] }
  0x6f   :  { %s1109_s3 = sld [smem:[#allocation7 + $0x4]] }
  0x70   :  { %1853 = sst [smem:[#allocation36_spill]] %s1099_s30 }
  0x71   :  { %s1111_s8 = sld [smem:[#allocation7 + $0x5]]  ;;  %v245_v9 = vstv %s1101_s6 }
  0x72   :  { %s1113_s9 = sld [smem:[#allocation7 + $0x6]]  ;;  %v262_v11 = vstv %s1103_s7  ;;  %v246_v21 = vadd.f32 %v245_v9, %v244_v7 }
  0x73   :  { %s1115_s10 = sld [smem:[#allocation7 + $0x7]]  ;;  %v276_v13 = vstv %s1105_s0  ;;  %v263_v24 = vadd.f32 %v262_v11, %v261_v10 }
  0x74   :  { %s1117_s11 = sld [smem:[#allocation7 + $0x8]]  ;;  %v290_v17 = vstv %s1107_s1  ;;  %v277_v25 = vadd.f32 %v276_v13, %v275_v12  ;;  %v1203_v32 = vmax.f32 %v246_v21, 0.0 }
  0x75   :  { %s1119_s5 = sld [smem:[#allocation7 + $0x9]]  ;;  %v304_v18 = vstv %s1109_s3  ;;  %v291_v27 = vadd.f32 %v290_v17, %v289_v14  ;;  %v1209_v35 = vmax.f32 %v263_v24, 0.0 }
  0x76   :  { %s1121_s30 = sld [smem:[#allocation7 + $0xa]]  ;;  %v305_v28 = vadd.f32 %v304_v18, %v303_v15  ;;  %v1211_v36 = vmax.f32 %v277_v25, 0.0 }
  0x77   :  { %s1123_s29 = sld [smem:[#allocation7 + $0xb]]  ;;  %v318_v19 = vstv %s1111_s8  ;;  %v1217_v39 = vmax.f32 %v291_v27, 0.0 }
  0x78   :  { %s1125_s28 = sld [smem:[#allocation7 + $0xc]]  ;;  %v332_v22 = vstv %s1113_s9  ;;  %v319_v29 = vadd.f32 %v318_v19, %v317_v16  ;;  %v1219_v40 = vmax.f32 %v305_v28, 0.0 }
  0x79   :  { %s1127_s2 = sld [smem:[#allocation7 + $0xd]]  ;;  %v333_v30 = vadd.f32 %v332_v22, %v331_v20  ;;  %v346_v33 = vstv %s1115_s10 }
  0x7a   :  { %s1129_s27 = sld [smem:[#allocation7 + $0xe]]  ;;  %v360_v37 = vstv %s1117_s11  ;;  %v1221_v41 = vmax.f32 %v319_v29, 0.0  ;;  %v347_v44 = vadd.f32 %v346_v33, %v345_v31 }
  0x7b   :  { %1854 = sst [smem:[#allocation37_spill]] %s1119_s5  ;;  %v1226_v43 = vmax.f32 %v333_v30, 0.0  ;;  %v361_v47 = vadd.f32 %v360_v37, %v359_v34 }
  0x7c   :  { %1855 = sst [smem:[#allocation38_spill]] %s1121_s30  ;;  %v1269_v12 = vmax.f32 %v347_v44, 0.0 }
  0x7d   :  { %1856 = sst [smem:[#allocation39_spill]] %s1123_s29  ;;  %v1274_v16 = vmax.f32 %v361_v47, 0.0 }
  0x7e   :  { %1857 = sst [smem:[#allocation40_spill]] %s1125_s28 }
  0x7f   :  { %1858 = sst [smem:[#allocation41_spill]] %s1127_s2 }
  0x80   :  { %1859 = sst [smem:[#allocation42_spill]] %s1129_s27 }
  0x81   :  { %s1131_s26 = sld [smem:[#allocation7 + $0xf]] }
  0x82   :  { %s1133_s25 = sld [smem:[#allocation7 + $0x10]] }
  0x83   :  { %s1135_s24 = sld [smem:[#allocation7 + $0x11]] }
  0x84   :  { %s1137_s5 = sld [smem:[#allocation7 + $0x12]] }
  0x85   :  { %s1139_s29 = sld [smem:[#allocation7 + $0x13]] }
  0x86   :  { %s1141_s28 = sld [smem:[#allocation7 + $0x14]] }
  0x87   :  { %1860 = sst [smem:[#allocation43_spill]] %s1131_s26 }
  0x88   :  { %1861 = sst [smem:[#allocation44_spill]] %s1133_s25 }
  0x89   :  { %1862 = sst [smem:[#allocation45_spill]] %s1135_s24 }
  0x8a   :  { %s1143_s2 = sld [smem:[#allocation7 + $0x15]]  ;;  %v500_v23 = vstv %s1137_s5 }
  0x8b   :  { %1863 = sst [smem:[#allocation46_spill]] %s1139_s29 }
  0x8c   :  { %s1145_s27 = sld [smem:[#allocation7 + $0x16]] }
  0x8d   :  { %s1147_s26 = sld [smem:[#allocation7 + $0x17]] }
  0x8e   :  { %s1149_s30 = sld [smem:[#allocation7 + $0x18]] }
  0x8f   :  { %s1151_s24 = sld [smem:[#allocation7 + $0x19]] }
  0x90   :  { %s1153_s25 = sld [smem:[#allocation7 + $0x1a]] }
  0x91   :  { %s1158_s29 = sld [smem:[#allocation7 + $0x1b]] }
  0x92   :  { %1864 = sst [smem:[#allocation47_spill]] %s1145_s27 }
  0x93   :  { %s1162_s27 = sld [smem:[#allocation7 + $0x1c]] }
  0x94   :  { %1865 = sst [smem:[#allocation48_spill]] %s1149_s30 }
  0x95   :  { %s1167_s30 = sld [smem:[#allocation7 + $0x1d]] }
  0x96   :  { %1866 = sst [smem:[#allocation49_spill]] %s1153_s25 }
  0x97   :  { %s1171_s25 = sld [smem:[#allocation7 + $0x1e]] }
  0x98   :  { %s1177_s12 = sld [smem:[#allocation7 + $0x1f]] }
  0x99   :  { %1867 = sst [smem:[#allocation50_spill]] %s1162_s27 }
  0x9a   :  { %s1183_s13 = sld [smem:[#allocation8]] }
  0x9b   :  { %1868 = sst [smem:[#allocation51_spill]] %s1167_s30 }
  0x9c   :  { %s1189_s14 = sld [smem:[#allocation8 + $0x1]] }
  0x9d   :  { %1869 = sst [smem:[#allocation52_spill]] %s1171_s25 }
  0x9e   :  { %1870 = sst [smem:[#allocation53_spill]] %s1177_s12 }
  0x9f   :  { %s1193_s15 = sld [smem:[#allocation8 + $0x2]] }
  0xa0   :  { %s1196_s16 = sld [smem:[#allocation8 + $0x3]]  ;;  %v248_v28 = vstv %s1183_s13 }
  0xa1   :  { %s1198_s4 = sld [smem:[#allocation8 + $0x4]]  ;;  %v1316_v47 = vmul.f32 %v248_v28, %v1203_v32 }
  0xa2   :  { %s1201_s17 = sld [smem:[#allocation8 + $0x5]]  ;;  %v252_v33 = vstv %s1189_s14 }
  0xa3   :  { %s1207_s18 = sld [smem:[#allocation8 + $0x6]] }
  0xa4   :  { %s1871_s19 = sld [smem:[#allocation18_spill]] }
  0xa5   :  { %s1872_s6 = sld [smem:[#allocation19_spill]]  ;;  %v256_v42 = vstv %s1193_s15 }
  0xa6   :  { %s1215_s7 = sld [smem:[#allocation8 + $0x7]] }
  0xa7   :  { %s1873_s0 = sld [smem:[#allocation37_spill]] }
  0xa8   :  { %s1874_s1 = sld [smem:[#allocation38_spill]] }
  0xa9   :  { %s1875_s3 = sld [smem:[#allocation20_spill]] }
  0xaa   :  { %s1224_s8 = sld [smem:[#allocation8 + $0x8]]  ;;  %v428_v49 = vstv %s1871_s19 }
  0xab   :  { %s1876_s9 = sld [smem:[#allocation39_spill]]  ;;  %v442_v50 = vstv %s1872_s6  ;;  %v429_v60 = vmul.f32 %v428_v49, %v1155_v0 }
  0xac   :  { %s1877_s20 = sld [smem:[#allocation21_spill]]  ;;  %v443_v61 = vmul.f32 %v442_v50, %v1155_v0  ;;  %v528_v50 = vstv %s1141_s28 }
  0xad   :  { %s1230_s10 = sld [smem:[#allocation8 + $0x9]]  ;;  %v374_v51 = vstv %s1873_s0 }
  0xae   :  { %s1878_s11 = sld [smem:[#allocation40_spill]]  ;;  %v388_v53 = vstv %s1874_s1  ;;  %v375_v63 = vadd.f32 %v374_v51, %v373_v48  ;;  %v265_v48 = vstv %s1196_s16  ;;  %v1325_v51 = vmul.f32 %v252_v33, %v1203_v32 }
  0xaf   :  { %s1879_s12 = sld [smem:[#allocation22_spill]]  ;;  %v456_v54 = vstv %s1875_s3  ;;  %v389_v4 = vadd.f32 %v388_v53, %v387_v52  ;;  %v268_v52 = vstv %s1198_s4 }
  0xb0   :  { %s1235_s25 = sld [smem:[#allocation8 + $0xa]]  ;;  %v457_v3 = vmul.f32 %v456_v54, %v1155_v0  ;;  %v1280_v20 = vmax.f32 %v375_v63, 0.0  ;;  %v282_v63 = vstv %s1215_s7 }
  0xb1   :  { %s1880_s21 = sld [smem:[#allocation41_spill]]  ;;  %v402_v56 = vstv %s1876_s9  ;;  %v1282_v21 = vmax.f32 %v389_v4, 0.0 }
  0xb2   :  { %s1881_s30 = sld [smem:[#allocation42_spill]]  ;;  %v470_v58 = vstv %s1877_s20  ;;  %v403_v8 = vadd.f32 %v402_v56, %v401_v55  ;;  %v1332_v55 = vmul.f32 %v256_v42, %v1203_v32  ;;  %v271_v56 = vstv %s1201_s17 }
  0xb3   :  { %s1241_s22 = sld [smem:[#allocation8 + $0xb]]  ;;  %v471_v6 = vmul.f32 %v470_v58, %v1155_v0  ;;  %v1348_v32 = vmul.f32 %v268_v52, %v1209_v35 }
  0xb4   :  { %s1882_s23 = sld [smem:[#allocation43_spill]]  ;;  %v416_v59 = vstv %s1878_s11  ;;  %v1287_v24 = vmax.f32 %v403_v8, 0.0  ;;  %v293_v8 = vstv %s1230_s10 }
  0xb5   :  { %s1883_s19 = sld [smem:[#allocation23_spill]]  ;;  %v484_v62 = vstv %s1879_s12  ;;  %v417_v9 = vadd.f32 %v416_v59, %v415_v57  ;;  %v1341_v59 = vmul.f32 %v265_v48, %v1209_v35 }
  0xb6   :  { %s1247_s6 = sld [smem:[#allocation8 + $0xc]]  ;;  %v485_v11 = vmul.f32 %v484_v62, %v1155_v0  ;;  %v542_v62 = vstv %s1143_s2 }
  0xb7   :  { %s1884_s0 = sld [smem:[#allocation44_spill]]  ;;  %v430_v1 = vstv %s1880_s21  ;;  %v1289_v25 = vmax.f32 %v417_v9, 0.0 }
  0xb8   :  { %s1253_s1 = sld [smem:[#allocation8 + $0xd]]  ;;  %v444_v2 = vstv %s1881_s30  ;;  %v431_v13 = vadd.f32 %v430_v1, %v429_v60  ;;  %v279_v60 = vstv %s1207_s18  ;;  %v285_v1 = vstv %s1224_s8 }
  0xb9   :  { %s1885_s3 = sld [smem:[#allocation45_spill]]  ;;  %v445_v14 = vadd.f32 %v444_v2, %v443_v61 }
  0xba   :  { %s1258_s9 = sld [smem:[#allocation8 + $0xe]]  ;;  %v458_v5 = vstv %s1882_s23  ;;  %v1295_v29 = vmax.f32 %v431_v13, 0.0  ;;  %v296_v13 = vstv %s1235_s25 }
  0xbb   :  { %s1886_s20 = sld [smem:[#allocation24_spill]]  ;;  %v498_v7 = vstv %s1883_s19  ;;  %v459_v17 = vadd.f32 %v458_v5, %v457_v3  ;;  %v1297_v30 = vmax.f32 %v445_v14, 0.0  ;;  %v1356_v3 = vmul.f32 %v271_v56, %v1209_v35 }
  0xbc   :  { %s1263_s11 = sld [smem:[#allocation8 + $0xf]]  ;;  %v499_v18 = vmul.f32 %v498_v7, %v1155_v0  ;;  %v1365_v7 = vmul.f32 %v279_v60, %v1211_v36  ;;  %v1372_v35 = vmul.f32 %v282_v63, %v1211_v36 }
  0xbd   :  { %v472_v10 = vstv %s1884_s0  ;;  %s1267_s30 = sld [smem:[#allocation8 + $0x10]]  ;;  %v1303_v34 = vmax.f32 %v459_v17, 0.0  ;;  %v307_v17 = vstv %s1247_s6 }
  0xbe   :  { %s1887_s12 = sld [smem:[#allocation25_spill]]  ;;  %v473_v22 = vadd.f32 %v472_v10, %v471_v6  ;;  %v501_v37 = vadd.f32 %v500_v23, %v499_v18  ;;  %v570_v23 = vstv %s1147_s26 }
  0xbf   :  { %v486_v15 = vstv %s1885_s3  ;;  %s1272_s21 = sld [smem:[#allocation8 + $0x11]] }
  0xc0   :  { %s1278_s23 = sld [smem:[#allocation8 + $0x12]]  ;;  %v487_v26 = vadd.f32 %v486_v15, %v485_v11  ;;  %v1309_v44 = vmax.f32 %v473_v22, 0.0  ;;  %v1335_v57 = vmax.f32 %v501_v37, 0.0  ;;  %v1375_v11 = vmul.f32 %v285_v1, %v1211_v36 }
  0xc1   :  { %v512_v19 = vstv %s1886_s20  ;;  %s1888_s19 = sld [smem:[#allocation46_spill]]  ;;  %v299_v15 = vstv %s1241_s22  ;;  %v1388_v22 = vmul.f32 %v293_v8, %v1217_v39  ;;  %v310_v36 = vstv %s1253_s1 }
  0xc2   :  { %s1285_s0 = sld [smem:[#allocation8 + $0x13]]  ;;  %v513_v31 = vmul.f32 %v512_v19, %v1155_v0  ;;  %v1319_v49 = vmax.f32 %v487_v26, 0.0  ;;  %v1405_v37 = vmul.f32 %v299_v15, %v1217_v39  ;;  %v313_v42 = vstv %s1258_s9 }
  0xc3   :  { %s1889_s3 = sld [smem:[#allocation26_spill]]  ;;  %v324_v52 = vstv %s1267_s30 }
  0xc4   :  { %v526_v27 = vstv %s1887_s12  ;;  %s1292_s20 = sld [smem:[#allocation8 + $0x14]] }
  0xc5   :  { %s1300_s5 = sld [smem:[#allocation8 + $0x15]]  ;;  %v527_v45 = vmul.f32 %v526_v27, %v1155_v0  ;;  %v1396_v27 = vmul.f32 %v296_v13, %v1217_v39 }
  0xc6   :  { %s1890_s27 = sld [smem:[#allocation27_spill]]  ;;  %v335_v63 = vstv %s1278_s23 }
  0xc7   :  { %v514_v38 = vstv %s1888_s19  ;;  %s1306_s12 = sld [smem:[#allocation8 + $0x16]]  ;;  %v529_v61 = vadd.f32 %v528_v50, %v527_v45  ;;  %v321_v45 = vstv %s1263_s11 }
  0xc8   :  { %s1313_s13 = sld [smem:[#allocation8 + $0x17]]  ;;  %v515_v53 = vadd.f32 %v514_v38, %v513_v31  ;;  %v1408_v38 = vmul.f32 %v307_v17, %v1219_v40  ;;  %v1431_v60 = vmul.f32 %v321_v45, %v1221_v41  ;;  %v338_v1 = vstv %s1285_s0 }
  0xc9   :  { %v540_v46 = vstv %s1889_s3  ;;  %s1322_s14 = sld [smem:[#allocation8 + $0x18]]  ;;  %v1378_v14 = vmax.f32 %v529_v61, 0.0  ;;  %v327_v61 = vstv %s1272_s21  ;;  %v626_v17 = vstv %s1158_s29 }
  0xca   :  { %s1329_s15 = sld [smem:[#allocation8 + $0x19]]  ;;  %v541_v58 = vmul.f32 %v540_v46, %v1155_v0  ;;  %v1358_v4 = vmax.f32 %v515_v53, 0.0  ;;  %v1415_v46 = vmul.f32 %v310_v36, %v1219_v40  ;;  %v341_v36 = vstv %s1292_s20 }
  0xcb   :  { %s1891_s16 = sld [smem:[#allocation47_spill]] }
  0xcc   :  { %v554_v54 = vstv %s1890_s27  ;;  %s1892_s28 = sld [smem:[#allocation28_spill]]  ;;  %v543_v9 = vadd.f32 %v542_v62, %v541_v58  ;;  %v1428_v58 = vmul.f32 %v313_v42, %v1219_v40  ;;  %v598_v62 = vstv %s1151_s24 }
  0xcd   :  { %s1338_s19 = sld [smem:[#allocation8 + $0x1a]]  ;;  %v555_v2 = vmul.f32 %v554_v54, %v1155_v0  ;;  %v1444_v40 = vmul.f32 %v324_v52, %v1221_v41  ;;  %v1481_v52 = vmul.f32 %v341_v36, %v1226_v43 }
  0xce   :  { %s1893_s27 = sld [smem:[#allocation29_spill]]  ;;  %v1398_v28 = vmax.f32 %v543_v9, 0.0  ;;  %v355_v42 = vstv %s1313_s13 }
  0xcf   :  { %s1345_s4 = sld [smem:[#allocation8 + $0x1b]]  ;;  %v363_v45 = vstv %s1322_s14 }
  0xd0   :  { %s1353_s17 = sld [smem:[#allocation8 + $0x1c]] }
  0xd1   :  { %v556_v5 = vstv %s1891_s16  ;;  %s1362_s2 = sld [smem:[#allocation8 + $0x1d]] }
  0xd2   :  { %v568_v6 = vstv %s1892_s28  ;;  %s1369_s18 = sld [smem:[#allocation8 + $0x1e]]  ;;  %v557_v18 = vadd.f32 %v556_v5, %v555_v2 }
  0xd3   :  { %s1894_s7 = sld [smem:[#allocation48_spill]]  ;;  %v569_v19 = vmul.f32 %v568_v6, %v1155_v0 }
  0xd4   :  { %v582_v10 = vstv %s1893_s27  ;;  %s1895_s8 = sld [smem:[#allocation30_spill]]  ;;  %v1417_v48 = vmax.f32 %v557_v18, 0.0  ;;  %v1461_v18 = vmul.f32 %v335_v63, %v1226_v43 }
  0xd5   :  { %s1380_s3 = sld [smem:[#allocation8 + $0x1f]]  ;;  %v583_v26 = vmul.f32 %v582_v10, %v1155_v0  ;;  %v571_v50 = vadd.f32 %v570_v23, %v569_v19  ;;  %v1453_v10 = vmul.f32 %v327_v61, %v1221_v41  ;;  %v1464_v19 = vmul.f32 %v338_v1, %v1226_v43 }
  0xd6   :  { %s1385_s10 = sld [smem:[#allocation8 + $0x20]]  ;;  %v349_v23 = vstv %s1300_s5  ;;  %v377_v63 = vstv %s1345_s4  ;;  %v1499_v43 = vmul.f32 %v355_v42, %v1269_v12 }
  0xd7   :  { %s1896_s25 = sld [smem:[#allocation31_spill]]  ;;  %v1446_v6 = vmax.f32 %v571_v50, 0.0  ;;  %v366_v50 = vstv %s1329_s15  ;;  %v1490_v61 = vmul.f32 %v349_v23, %v1269_v12  ;;  %v380_v23 = vstv %s1353_s17 }
  0xd8   :  { %s1393_s16 = sld [smem:[#allocation8 + $0x21]] }
  0xd9   :  { %v584_v31 = vstv %s1894_s7  ;;  %s1897_s22 = sld [smem:[#allocation32_spill]] }
  0xda   :  { %v596_v33 = vstv %s1895_s8  ;;  %s1402_s6 = sld [smem:[#allocation8 + $0x22]]  ;;  %v585_v53 = vadd.f32 %v584_v31, %v583_v26  ;;  %v352_v26 = vstv %s1306_s12 }
  0xdb   :  { %s1412_s26 = sld [smem:[#allocation8 + $0x23]]  ;;  %v597_v54 = vmul.f32 %v596_v33, %v1155_v0 }
  0xdc   :  { %s1898_s1 = sld [smem:[#allocation33_spill]]  ;;  %v1455_v13 = vmax.f32 %v585_v53, 0.0  ;;  %v369_v53 = vstv %s1338_s19 }
  0xdd   :  { %v610_v39 = vstv %s1896_s25  ;;  %s1420_s28 = sld [smem:[#allocation8 + $0x24]]  ;;  %v599_v15 = vadd.f32 %v598_v62, %v597_v54  ;;  %v1493_v62 = vmul.f32 %v352_v26, %v1269_v12 }
  0xde   :  { %s1899_s9 = sld [smem:[#allocation49_spill]]  ;;  %v611_v2 = vmul.f32 %v610_v39, %v1155_v0 }
  0xdf   :  { %v624_v56 = vstv %s1897_s22  ;;  %s1425_s11 = sld [smem:[#allocation8 + $0x25]]  ;;  %v1484_v54 = vmax.f32 %v599_v15, 0.0 }
  0xe0   :  { %s1435_s27 = sld [smem:[#allocation8 + $0x26]]  ;;  %v625_v9 = vmul.f32 %v624_v56, %v1155_v0 }
  0xe1   :  { %s1441_s30 = sld [smem:[#allocation8 + $0x27]] }
  0xe2   :  { %v638_v5 = vstv %s1898_s1  ;;  %s1900_s24 = sld [smem:[#allocation50_spill]]  ;;  %v627_v39 = vadd.f32 %v626_v17, %v625_v9  ;;  %v1512_v9 = vmul.f32 %v369_v53, %v1274_v16 }
  0xe3   :  { %s1450_s21 = sld [smem:[#allocation8 + $0x28]]  ;;  %v639_v41 = vmul.f32 %v638_v5, %v1155_v0  ;;  %v1505_v5 = vmul.f32 %v366_v50, %v1274_v16 }
  0xe4   :  { %v612_v8 = vstv %s1899_s9  ;;  %s1458_s23 = sld [smem:[#allocation8 + $0x29]]  ;;  %v1514_v15 = vmax.f32 %v627_v39, 0.0  ;;  %v391_v39 = vstv %s1369_s18 }
  0xe5   :  { %s1901_s0 = sld [smem:[#allocation34_spill]]  ;;  %v613_v31 = vadd.f32 %v612_v8, %v611_v2  ;;  %v1502_v2 = vmul.f32 %v363_v45, %v1274_v16 }
  0xe6   :  { %s1468_s7 = sld [smem:[#allocation10]] }
  0xe7   :  { %s1473_s29 = sld [smem:[#allocation10 + $0x1]]  ;;  %v1507_v8 = vmax.f32 %v613_v31, 0.0 }
  0xe8   :  { %v640_v33 = vstv %s1900_s24  ;;  %s1478_s8 = sld [smem:[#allocation10 + $0x2]] }
  0xe9   :  { %s1902_s20 = sld [smem:[#allocation35_spill]]  ;;  %v641_v1 = vadd.f32 %v640_v33, %v639_v41  ;;  %v1522_v41 = vmul.f32 %v377_v63, %v1280_v20  ;;  %v383_v33 = vstv %s1362_s2 }
  0xea   :  { %s1487_s5 = sld [smem:[#allocation8 + $0x2a]] }
  0xeb   :  { %v652_v56 = vstv %s1901_s0  ;;  %s1903_s12 = sld [smem:[#allocation51_spill]]  ;;  %v1531_v42 = vmax.f32 %v641_v1, 0.0 }
  0xec   :  { %s1496_s13 = sld [smem:[#allocation8 + $0x2b]]  ;;  %v653_v12 = vmul.f32 %v652_v56, %v1155_v0  ;;  %v250_v36 = vstv %s1468_s7 }
  0xed   :  { %s1509_s14 = sld [smem:[#allocation8 + $0x2c]]  ;;  %v251_v16 = vadd.f32 %v250_v36, %v1316_v47  ;;  %v254_v31 = vstv %s1473_s29 }
  0xee   :  { %s1518_s15 = sld [smem:[#allocation8 + $0x2d]]  ;;  %v255_v45 = vadd.f32 %v254_v31, %v1325_v51  ;;  %v258_v50 = vstv %s1478_s8  ;;  %v1549_v51 = vmul.f32 %v380_v23, %v1280_v20  ;;  %v1552_v31 = vmul.f32 %v383_v33, %v1280_v20 }
  0xef   :  { %v666_v17 = vstv %s1902_s20  ;;  %s1904_s19 = sld [smem:[#allocation52_spill]]  ;;  %v259_v56 = vadd.f32 %v258_v50, %v1332_v55  ;;  %v267_v47 = vadd.f32 %v1341_v59, %v251_v16  ;;  %v394_v16 = vstv %s1380_s3 }
  0xf0   :  { %s1905_s4 = sld [smem:[#allocation36_spill]]  ;;  %v667_v53 = vmul.f32 %v666_v17, %v1155_v0  ;;  %v270_v1 = vadd.f32 %v1348_v32, %v255_v45  ;;  %v397_v50 = vstv %s1385_s10  ;;  %v1564_v23 = vmul.f32 %v391_v39, %v1282_v21 }
  0xf1   :  { %v654_v26 = vstv %s1903_s12  ;;  %s1526_s25 = sld [smem:[#allocation8 + $0x2e]]  ;;  %v273_v55 = vadd.f32 %v1356_v3, %v259_v56  ;;  %v281_v59 = vadd.f32 %v1365_v7, %v267_v47  ;;  %v1577_v45 = vmul.f32 %v394_v16, %v1282_v21 }
  0xf2   :  { %s1533_s22 = sld [smem:[#allocation8 + $0x2f]]  ;;  %v655_v17 = vadd.f32 %v654_v26, %v653_v12  ;;  %v284_v32 = vadd.f32 %v1372_v35, %v270_v1  ;;  %v405_v26 = vstv %s1393_s16  ;;  %v1580_v39 = vmul.f32 %v397_v50, %v1282_v21 }
  0xf3   :  { %s1539_s17 = sld [smem:[#allocation8 + $0x30]]  ;;  %v287_v3 = vadd.f32 %v1375_v11, %v273_v55  ;;  %v295_v7 = vadd.f32 %v1388_v22, %v281_v59  ;;  %v411_v56 = vstv %s1412_s26  ;;  %v1594_v47 = vmul.f32 %v405_v26, %v1287_v24 }
  0xf4   :  { %s1545_s2 = sld [smem:[#allocation8 + $0x31]]  ;;  %v298_v35 = vadd.f32 %v1396_v27, %v284_v32  ;;  %v422_v1 = vstv %s1425_s11  ;;  %v1609_v55 = vmul.f32 %v411_v56, %v1287_v24  ;;  %v425_v59 = vstv %s1435_s27 }
  0xf5   :  { %v668_v63 = vstv %s1904_s19  ;;  %s1906_s18 = sld [smem:[#allocation53_spill]]  ;;  %v301_v11 = vadd.f32 %v1405_v37, %v287_v3  ;;  %v309_v22 = vadd.f32 %v1408_v38, %v295_v7  ;;  %v433_v16 = vstv %s1441_s30 }
  0xf6   :  { %v680_v36 = vstv %s1905_s4  ;;  %s1554_s1 = sld [smem:[#allocation8 + $0x32]]  ;;  %v669_v20 = vadd.f32 %v668_v63, %v667_v53  ;;  %v408_v53 = vstv %s1402_s6  ;;  %v312_v27 = vadd.f32 %v1415_v46, %v298_v35 }
  0xf7   :  { %s1560_s9 = sld [smem:[#allocation8 + $0x33]]  ;;  %v681_v12 = vmul.f32 %v680_v36, %v1155_v0  ;;  %v1582_v0 = vmax.f32 %v655_v17, 0.0  ;;  %v315_v37 = vadd.f32 %v1428_v58, %v301_v11  ;;  %v323_v38 = vadd.f32 %v1431_v60, %v309_v22 }
  0xf8   :  { %s1567_s24 = sld [smem:[#allocation8 + $0x34]]  ;;  %v1596_v21 = vmax.f32 %v669_v20, 0.0  ;;  %v419_v36 = vstv %s1420_s28  ;;  %v326_v46 = vadd.f32 %v1444_v40, %v312_v27  ;;  %v409_v17 = vmul.f32 %v408_v53, %v1287_v24 }
  0xf9   :  { %s1573_s3 = sld [smem:[#allocation8 + $0x35]]  ;;  %v329_v58 = vadd.f32 %v1453_v10, %v315_v37  ;;  %v337_v60 = vadd.f32 %v1461_v18, %v323_v38  ;;  %v436_v50 = vstv %s1450_s21  ;;  %v420_v32 = vmul.f32 %v419_v36, %v1289_v25 }
  0xfa   :  { %s1584_s10 = sld [smem:[#allocation8 + $0x36]]  ;;  %v340_v40 = vadd.f32 %v1464_v19, %v326_v46  ;;  %v423_v24 = vmul.f32 %v422_v1, %v1289_v25  ;;  %v447_v3 = vstv %s1487_s5  ;;  %v426_v7 = vmul.f32 %v425_v59, %v1289_v25 }
  0xfb   :  { %v682_v33 = vstv %s1906_s18  ;;  %s1590_s16 = sld [smem:[#allocation8 + $0x37]]  ;;  %v343_v10 = vadd.f32 %v1481_v52, %v329_v58  ;;  %v351_v18 = vadd.f32 %v1490_v61, %v337_v60  ;;  %v434_v26 = vmul.f32 %v433_v16, %v1295_v29 }
  0xfc   :  { %v683_v63 = vadd.f32 %v682_v33, %v681_v12  ;;  %s1598_s0 = sld [smem:[#allocation8 + $0x38]]  ;;  %v439_v12 = vstv %s1458_s23  ;;  %v354_v19 = vadd.f32 %v1493_v62, %v340_v40  ;;  %v437_v33 = vmul.f32 %v436_v50, %v1295_v29 }
  0xfd   :  { %s1604_s6 = sld [smem:[#allocation8 + $0x39]]  ;;  %v357_v52 = vadd.f32 %v1499_v43, %v343_v10  ;;  %v365_v61 = vadd.f32 %v1502_v2, %v351_v18  ;;  %v450_v35 = vstv %s1496_s13  ;;  %v453_v11 = vstv %s1509_s14 }
  0xfe   :  { %s1612_s26 = sld [smem:[#allocation8 + $0x3a]]  ;;  %v1623_v20 = vmax.f32 %v683_v63, 0.0  ;;  %v368_v62 = vadd.f32 %v1505_v5, %v354_v19  ;;  %v440_v25 = vmul.f32 %v439_v12, %v1295_v29  ;;  %v448_v22 = vmul.f32 %v447_v3, %v1297_v30 }
  0xff   :  { %s1618_s28 = sld [smem:[#allocation8 + $0x3b]]  ;;  %v461_v53 = vstv %s1518_s15  ;;  %v371_v43 = vadd.f32 %v1512_v9, %v357_v52  ;;  %v379_v2 = vadd.f32 %v1522_v41, %v365_v61  ;;  %v464_v56 = vstv %s1526_s25 }
 0x100   :  { %s1625_s11 = sld [smem:[#allocation8 + $0x3c]]  ;;  %v467_v27 = vstv %s1533_s22  ;;  %v382_v63 = vadd.f32 %v1549_v51, %v368_v62  ;;  %v451_v5 = vmul.f32 %v450_v35, %v1297_v30  ;;  %v454_v29 = vmul.f32 %v453_v11, %v1297_v30 }
 0x101   :  { %s1631_s27 = sld [smem:[#allocation8 + $0x3d]]  ;;  %v475_v37 = vstv %s1539_s17  ;;  %v385_v38 = vadd.f32 %v1552_v31, %v371_v43  ;;  %v393_v9 = vadd.f32 %v1564_v23, %v379_v2  ;;  %v478_v41 = vstv %s1545_s2 }
 0x102   :  { %s1637_s30 = sld [smem:[#allocation8 + $0x3e]]  ;;  %v481_v36 = vstv %s1554_s1  ;;  %v396_v1 = vadd.f32 %v1577_v45, %v382_v63  ;;  %v462_v51 = vmul.f32 %v461_v53, %v1303_v34  ;;  %v465_v46 = vmul.f32 %v464_v56, %v1303_v34 }
 0x103   :  { %s1643_s21 = sld [smem:[#allocation8 + $0x3f]]  ;;  %v468_v30 = vmul.f32 %v467_v27, %v1303_v34  ;;  %v399_v31 = vadd.f32 %v1580_v39, %v385_v38  ;;  %v407_v23 = vadd.f32 %v1594_v47, %v393_v9  ;;  %v489_v59 = vstv %s1560_s9 }
 0x104   :  { %s1649_s23 = sld [smem:[#allocation8 + $0x40]]  ;;  %v492_v58 = vstv %s1567_s24  ;;  %v410_v45 = vadd.f32 %v409_v17, %v396_v1  ;;  %v476_v60 = vmul.f32 %v475_v37, %v1309_v44  ;;  %v479_v16 = vmul.f32 %v478_v41, %v1309_v44 }
 0x105   :  { %s1655_s7 = sld [smem:[#allocation8 + $0x41]]  ;;  %v482_v34 = vmul.f32 %v481_v36, %v1309_v44  ;;  %v413_v39 = vadd.f32 %v1609_v55, %v399_v31  ;;  %v421_v50 = vadd.f32 %v420_v32, %v407_v23  ;;  %v495_v47 = vstv %s1573_s3 }
 0x106   :  { %s1661_s29 = sld [smem:[#allocation8 + $0x42]]  ;;  %v503_v40 = vstv %s1584_s10  ;;  %v424_v10 = vadd.f32 %v423_v24, %v410_v45  ;;  %v490_v17 = vmul.f32 %v489_v59, %v1319_v49  ;;  %v493_v18 = vmul.f32 %v492_v58, %v1319_v49 }
 0x107   :  { %s1667_s8 = sld [smem:[#allocation8 + $0x43]]  ;;  %v506_v12 = vstv %s1590_s16  ;;  %v427_v44 = vadd.f32 %v426_v7, %v413_v39  ;;  %v435_v3 = vadd.f32 %v434_v26, %v421_v50  ;;  %v509_v19 = vstv %s1598_s0 }
 0x108   :  { %s1673_s20 = sld [smem:[#allocation8 + $0x44]]  ;;  %v517_v55 = vstv %s1604_s6  ;;  %v438_v32 = vadd.f32 %v437_v33, %v424_v10  ;;  %v496_v52 = vmul.f32 %v495_v47, %v1319_v49  ;;  %v504_v24 = vmul.f32 %v503_v40, %v1335_v57 }
 0x109   :  { %s1679_s5 = sld [smem:[#allocation8 + $0x45]]  ;;  %v520_v61 = vstv %s1612_s26  ;;  %v441_v35 = vadd.f32 %v440_v25, %v427_v44  ;;  %v449_v11 = vadd.f32 %v448_v22, %v435_v3  ;;  %v523_v62 = vstv %s1618_s28 }
 0x10a   :  { %s1684_s12 = sld [smem:[#allocation8 + $0x46]]  ;;  %v531_v53 = vstv %s1625_s11  ;;  %v452_v7 = vadd.f32 %v451_v5, %v438_v32  ;;  %v507_v26 = vmul.f32 %v506_v12, %v1335_v57  ;;  %v510_v33 = vmul.f32 %v509_v19, %v1335_v57 }
 0x10b   :  { %s1689_s13 = sld [smem:[#allocation8 + $0x47]]  ;;  %v518_v49 = vmul.f32 %v517_v55, %v1358_v4  ;;  %v455_v43 = vadd.f32 %v454_v29, %v441_v35  ;;  %v463_v2 = vadd.f32 %v462_v51, %v449_v11  ;;  %v534_v56 = vstv %s1631_s27 }
 0x10c   :  { %s1694_s14 = sld [smem:[#allocation8 + $0x48]]  ;;  %v537_v25 = vstv %s1637_s30  ;;  %v466_v22 = vadd.f32 %v465_v46, %v452_v7  ;;  %v521_v27 = vmul.f32 %v520_v61, %v1358_v4  ;;  %v524_v63 = vmul.f32 %v523_v62, %v1358_v4 }
 0x10d   :  { %s1698_s15 = sld [smem:[#allocation8 + $0x49]]  ;;  %v532_v57 = vmul.f32 %v531_v53, %v1378_v14  ;;  %v469_v5 = vadd.f32 %v468_v30, %v455_v43  ;;  %v477_v37 = vadd.f32 %v476_v60, %v463_v2  ;;  %v545_v29 = vstv %s1643_s21 }
 0x10e   :  { %s1703_s19 = sld [smem:[#allocation8 + $0x4a]]  ;;  %v548_v38 = vstv %s1649_s23  ;;  %v480_v9 = vadd.f32 %v479_v16, %v466_v22  ;;  %v535_v41 = vmul.f32 %v534_v56, %v1378_v14  ;;  %v538_v36 = vmul.f32 %v537_v25, %v1378_v14 }
 0x10f   :  { %s1707_s4 = sld [smem:[#allocation8 + $0x4b]]  ;;  %v551_v4 = vstv %s1655_s7  ;;  %v483_v1 = vadd.f32 %v482_v34, %v469_v5  ;;  %v491_v51 = vadd.f32 %v490_v17, %v477_v37  ;;  %v559_v46 = vstv %s1661_s29  ;;  %s989_s7 = smov [#allocation12]  }
 0x110   :  { %s1712_s25 = sld [smem:[#allocation8 + $0x4c]]  ;;  %v562_v30 = vstv %s1667_s8  ;;  %v494_v31 = vadd.f32 %v493_v18, %v480_v9  ;;  %v546_v23 = vmul.f32 %v545_v29, %v1398_v28  ;;  %v549_v59 = vmul.f32 %v548_v38, %v1398_v28  ;;  %s706_s29 = sshll.u32 %s989_s7, 4  ;;  %s707_s29 = int_to_ptr.vmem [resolvable:$true] %s706_s29 }
 0x111   :  { %s1716_s22 = sld [smem:[#allocation8 + $0x4d]]  ;;  %v565_v58 = vstv %s1673_s20  ;;  %v497_v14 = vadd.f32 %v496_v52, %v483_v1  ;;  %v505_v45 = vadd.f32 %v504_v24, %v491_v51  ;;  %v573_v60 = vstv %s1679_s5  ;;  %s954_s8 = scalar_lea.vmem %s707_s29, 384 }
 0x112   :  { %s1721_s17 = sld [smem:[#allocation8 + $0x4e]]  ;;  %v576_v16 = vstv %s1684_s12  ;;  %v508_v34 = vadd.f32 %v507_v26, %v494_v31  ;;  %v552_v39 = vmul.f32 %v551_v4, %v1398_v28  ;;  %v560_v50 = vmul.f32 %v559_v46, %v1417_v48  ;;  %p955_p6 = scmp.ne.s32.totalorder %s707_s29, %s954_s8 }
 0x113   :  { %s1725_s2 = sld [smem:[#allocation8 + $0x4f]]  ;;  %v563_v47 = vmul.f32 %v562_v30, %v1417_v48  ;;  %v511_v40 = vadd.f32 %v510_v33, %v497_v14  ;;  %v519_v10 = vadd.f32 %v518_v49, %v505_v45  ;;  %v579_v17 = vstv %s1689_s13  ;;  %p959_p7 = scmp.lt.s32.totalorder %s707_s29, %s707_s29 }
 0x114   :  { %s1730_s18 = sld [smem:[#allocation8 + $0x50]]  ;;  %v587_v18 = vstv %s1694_s14  ;;  %v522_v12 = vadd.f32 %v521_v27, %v508_v34  ;;  %v566_v44 = vmul.f32 %v565_v58, %v1417_v48  ;;  %v574_v28 = vmul.f32 %v573_v60, %v1446_v6  ;;  %p960_p8 = scmp.lt.s32.totalorder %s954_s8, %s954_s8 }
 0x115   :  { %s1734_s1 = sld [smem:[#allocation8 + $0x51]]  ;;  %v577_v3 = vmul.f32 %v576_v16, %v1446_v6  ;;  %v525_v19 = vadd.f32 %v524_v63, %v511_v40  ;;  %v533_v55 = vadd.f32 %v532_v57, %v519_v10  ;;  %v590_v32 = vstv %s1698_s15 }
 0x116   :  { %s1739_s9 = sld [smem:[#allocation8 + $0x52]]  ;;  %v593_v52 = vstv %s1703_s19  ;;  %v536_v24 = vadd.f32 %v535_v41, %v522_v12  ;;  %v580_v61 = vmul.f32 %v579_v17, %v1446_v6  ;;  %v588_v48 = vmul.f32 %v587_v18, %v1455_v13  ;;  %p961_p9 = por %p960_p8, %p959_p7 }
 0x117   :  { %s1743_s24 = sld [smem:[#allocation8 + $0x53]]  ;;  %v601_v35 = vstv %s1707_s4  ;;  %v539_v11 = vadd.f32 %v538_v36, %v525_v19  ;;  %v547_v62 = vadd.f32 %v546_v23, %v533_v55  ;;  %v604_v53 = vstv %s1712_s25 }
 0x118   :  { %s1748_s3 = sld [smem:[#allocation8 + $0x54]]  ;;  %v607_v7 = vstv %s1716_s22  ;;  %v550_v26 = vadd.f32 %v549_v59, %v536_v24  ;;  %v591_v33 = vmul.f32 %v590_v32, %v1455_v13  ;;  %v594_v49 = vmul.f32 %v593_v52, %v1455_v13  ;;  %p962_p10 = pnand %p961_p9, %p955_p6 }
 0x119   :  { %s1752_s10 = sld [smem:[#allocation8 + $0x55]]  ;;  %v615_v6 = vstv %s1721_s17  ;;  %v553_v43 = vadd.f32 %v552_v39, %v539_v11  ;;  %v561_v2 = vadd.f32 %v560_v50, %v547_v62  ;;  %v618_v56 = vstv %s1725_s2 }
 0x11a   :  { %s1757_s16 = sld [smem:[#allocation8 + $0x56]]  ;;  %v621_v25 = vstv %s1730_s18  ;;  %v564_v22 = vadd.f32 %v563_v47, %v550_v26  ;;  %v602_v27 = vmul.f32 %v601_v35, %v1484_v54  ;;  %v605_v63 = vmul.f32 %v604_v53, %v1484_v54 }
 0x11b   :  { %s1761_s0 = sld [smem:[#allocation8 + $0x57]]  ;;  %v608_v57 = vmul.f32 %v607_v7, %v1484_v54  ;;  %v567_v13 = vadd.f32 %v566_v44, %v553_v43  ;;  %v575_v5 = vadd.f32 %v574_v28, %v561_v2  ;;  %v629_v37 = vstv %s1734_s1 }
 0x11c   :  { %s1766_s6 = sld [smem:[#allocation8 + $0x58]]  ;;  %v632_v29 = vstv %s1739_s9  ;;  %v578_v38 = vadd.f32 %v577_v3, %v564_v22  ;;  %v616_v9 = vmul.f32 %v615_v6, %v1507_v8  ;;  %v619_v41 = vmul.f32 %v618_v56, %v1507_v8 }
 0x11d   :  { %s1770_s26 = sld [smem:[#allocation8 + $0x59]]  ;;  %v622_v36 = vmul.f32 %v621_v25, %v1507_v8  ;;  %v581_v54 = vadd.f32 %v580_v61, %v567_v13  ;;  %v589_v4 = vadd.f32 %v588_v48, %v575_v5  ;;  %v635_v1 = vstv %s1743_s24 }
 0x11e   :  { %s1775_s28 = sld [smem:[#allocation8 + $0x5a]]  ;;  %v643_v51 = vstv %s1748_s3  ;;  %v592_v46 = vadd.f32 %v591_v33, %v578_v38  ;;  %v630_v30 = vmul.f32 %v629_v37, %v1514_v15  ;;  %v633_v31 = vmul.f32 %v632_v29, %v1514_v15 }
 0x11f   :  { %s1779_s11 = sld [smem:[#allocation8 + $0x5b]]  ;;  %v646_v23 = vstv %s1752_s10  ;;  %v595_v59 = vadd.f32 %v594_v49, %v581_v54  ;;  %v603_v58 = vadd.f32 %v602_v27, %v589_v4  ;;  %v636_v60 = vmul.f32 %v635_v1, %v1514_v15 }
 0x120   :  { %s1784_s27 = sld [smem:[#allocation8 + $0x5c]]  ;;  %v649_v8 = vstv %s1757_s16  ;;  %v606_v45 = vadd.f32 %v605_v63, %v592_v46  ;;  %v644_v16 = vmul.f32 %v643_v51, %v1531_v42  ;;  %v647_v47 = vmul.f32 %v646_v23, %v1531_v42 }
 0x121   :  { %s1788_s30 = sld [smem:[#allocation8 + $0x5d]]  ;;  %v657_v14 = vstv %s1761_s0  ;;  %v609_v39 = vadd.f32 %v608_v57, %v595_v59  ;;  %v617_v50 = vadd.f32 %v616_v9, %v603_v58  ;;  %v650_v17 = vmul.f32 %v649_v8, %v1531_v42 }
 0x122   :  { %s1793_s21 = sld [smem:[#allocation8 + $0x5e]]  ;;  %v660_v34 = vstv %s1766_s6  ;;  %v620_v10 = vadd.f32 %v619_v41, %v606_v45  ;;  %v658_v18 = vmul.f32 %v657_v14, %v1582_v0 }
 0x123   :  { %s1797_s23 = sld [smem:[#allocation8 + $0x5f]]  ;;  %v663_v40 = vstv %s1770_s26  ;;  %v623_v44 = vadd.f32 %v622_v36, %v609_v39  ;;  %v631_v15 = vadd.f32 %v630_v30, %v617_v50  ;;  %v661_v28 = vmul.f32 %v660_v34, %v1582_v0 }
 0x124   :  { %v671_v12 = vstv %s1775_s28  ;;  %v634_v19 = vadd.f32 %v633_v31, %v620_v10  ;;  %v664_v55 = vmul.f32 %v663_v40, %v1582_v0 }
 0x125   :  { %v674_v3 = vstv %s1779_s11  ;;  %v637_v24 = vadd.f32 %v636_v60, %v623_v44  ;;  %v645_v61 = vadd.f32 %v644_v16, %v631_v15  ;;  %v672_v48 = vmul.f32 %v671_v12, %v1596_v21 }
 0x126   :  { %v677_v32 = vstv %s1784_s27  ;;  %v648_v42 = vadd.f32 %v647_v47, %v634_v19  ;;  %v675_v11 = vmul.f32 %v674_v3, %v1596_v21 }
 0x127   :  { %v685_v52 = vstv %s1788_s30  ;;  %v651_v53 = vadd.f32 %v650_v17, %v637_v24  ;;  %v659_v7 = vadd.f32 %v658_v18, %v645_v61  ;;  %v678_v26 = vmul.f32 %v677_v32, %v1596_v21 }
 0x128   :  { %v688_v35 = vstv %s1793_s21  ;;  %v686_v33 = vmul.f32 %v685_v52, %v1623_v20  ;;  %v662_v49 = vadd.f32 %v661_v28, %v648_v42 }
 0x129   :  { %v691_v62 = vstv %s1797_s23  ;;  %v689_v0 = vmul.f32 %v688_v35, %v1623_v20  ;;  %v665_v6 = vadd.f32 %v664_v55, %v651_v53  ;;  %v673_v43 = vadd.f32 %v672_v48, %v659_v7 }
 0x12a   :  { %v692_v2 = vmul.f32 %v691_v62, %v1623_v20  ;;  %v676_v56 = vadd.f32 %v675_v11, %v662_v49 }
 0x12b   :  { %v679_v25 = vadd.f32 %v678_v26, %v665_v6  ;;  %v687_v22 = vadd.f32 %v686_v33, %v673_v43 }
 0x12c   :  { %v690_v27 = vadd.f32 %v689_v0, %v676_v56 }
 0x12d   :  { %v693_v63 = vadd.f32 %v692_v2, %v679_v25  ;;  %694 = vst [vmem:[#allocation12] sm:$0xff] %v687_v22 }
 0x12e   :  { %697 = vst [vmem:[#allocation12 + $0x8] sm:$0xff] %v690_v27 }
 0x12f   :  { %700 = vst [vmem:[#allocation12 + $0x10] sm:$0xff] %v693_v63 }
 0x130   :  { %965 = shalt.err (!%p962_p10)
}
 0x131   :  { %s990_s20 = smov 128   ;;  %s991_s5 = smov 8  }
 0x132   :  { %s1907_s14 = sld [smem:[#allocation54_spill]] }
 0x138   :  { %712 = dma.vmem_to_hbm [thread:$0]  %s707_s29, 384, %s1907_s14, [#allocation4], %s990_s20, %s990_s20, %s991_s5  }
 0x139   :  { %982 = dma.done.wait [#allocation4], 384  }
 0x13a   :  { %983 = vsyncadd [#allocation4], 4294966912 }
 0x13b   :  { %716 = vsyncpa [#allocation3], 1 }
 0x13c   :  { %717 = vsyncpa [#allocation4], 1 }
 0x13d   :  { %718 = vsyncpa [#allocation5], 1 }
 0x13e   :  { %719 = vsyncpa [#allocation6], 1 }
 0x13f   :  { %720 = vsyncpa [#allocation9], 1 }

</bundles_post_ra>
